<compile_context>
chip_gen: v7x
topology: tpu7x:2x2x1
jax: 0.10.0
libtpu: 0.0.40
codegen_flags: <defaults>
</compile_context>

<pallas_src>
import functools

import jax
import jax.numpy as jnp
from jax import lax
from jax.experimental import pallas as pl
from jax.experimental.pallas import tpu as pltpu

_LANE = 128


def _round_up(x, m):
    return (x + m - 1) // m * m


# --------------------------------- Pallas kernel ---------------------------------

def _resblock_kernel(*refs, stride, Ho, Wo, E_h, has_proj):
    """Fused ResidualBlock forward for one batch element.

    refs = (xph, xs, w1, b1, w2, b2[, ws, bs], out, y1_scratch)
      xph : (1, s*s*E_h, E_w, Cip) f32   stride-phase-split, spatially padded input
      xs  : (1, Ho, Wo, Cip|Cop)   f32   shortcut input (subsampled x for projection)
      w1  : (9, Cip, Cop) bf16           conv1 taps, BN1 scale folded in
      b1  : (1, Cop) f32                 BN1 bias
      w2  : (9, Cop, Cop) bf16           conv2 taps, BN2 scale folded in
      b2  : (1, Cop) f32
      ws  : (Cip, Cop) bf16              1x1 projection weight, BNs scale folded in
      bs  : (1, Cop) f32
      out : (1, Ho, Wo, Cop) f32
      y1s : (Ho+2, Wo+2, Cop) f32 VMEM scratch (conv1 output + 1-px zero halo)
    """
    if has_proj:
        (xph_ref, xs_ref, w1_ref, b1_ref, w2_ref, b2_ref,
         ws_ref, bs_ref, o_ref, y1_ref) = refs
    else:
        (xph_ref, xs_ref, w1_ref, b1_ref, w2_ref, b2_ref,
         o_ref, y1_ref) = refs

    s = stride
    M = Ho * Wo
    Cip = xph_ref.shape[-1]
    Cop = o_ref.shape[-1]

    # ---- conv1 (3x3, stride s) as 9 accumulating MXU dots (implicit im2col) ----
    acc = jnp.zeros((M, Cop), jnp.float32)
    for t in range(9):
        di, dj = t // 3, t % 3
        row0 = ((di % s) * s + (dj % s)) * E_h + di // s      # phase-major row offset
        col0 = dj // s
        xt = (xph_ref[0, row0:row0 + Ho, col0:col0 + Wo, :]
              .reshape(M, Cip).astype(jnp.bfloat16))           # bf16 MXU operand
        acc = acc + jnp.dot(xt, w1_ref[t], preferred_element_type=jnp.float32)
    y1 = jnp.maximum(acc + b1_ref[...], 0.0)                   # BN1 bias + ReLU (f32, VPU)

    # ---- stage y1 (+ zero halo) in VMEM: conv2 reads it directly, no HBM trip ----
    y1_ref[...] = jnp.zeros_like(y1_ref)
    y1_ref[1:1 + Ho, 1:1 + Wo, :] = y1.reshape(Ho, Wo, Cop)

    # ---- conv2 (3x3, stride 1) + BN2 bias ----
    acc = jnp.zeros((M, Cop), jnp.float32)
    for t in range(9):
        di, dj = t // 3, t % 3
        yt = (y1_ref[di:di + Ho, dj:dj + Wo, :]
              .reshape(M, Cop).astype(jnp.bfloat16))
        acc = acc + jnp.dot(yt, w2_ref[t], preferred_element_type=jnp.float32)
    acc = acc + b2_ref[...]

    # ---- shortcut ----
    if has_proj:
        xs = xs_ref[...].reshape(M, Cip).astype(jnp.bfloat16)
        short = jnp.dot(xs, ws_ref[...],
                        preferred_element_type=jnp.float32) + bs_ref[...]
    else:
        short = xs_ref[...].reshape(M, Cop)                    # identity add: no MXU work

    out = jnp.maximum(acc + short, 0.0)                        # residual add + final ReLU
    o_ref[...] = out.reshape(1, Ho, Wo, Cop).astype(o_ref.dtype)


# ------------------------------- wrapper (plain JAX) ------------------------------

def _fold_bn(gamma, beta, mean, var, eps=1e-5):
    scale = gamma / jnp.sqrt(var + eps)
    bias = beta - mean * scale
    return scale.reshape(1, -1), bias.reshape(1, -1)


def _conv3x3_taps(w_oihw, scale, cin_p, cout_p):
    """(Cout, Cin, 3, 3) OIHW -> (9, Cip, Cop) tap-major bf16, BN scale folded in."""
    co, ci, kh, kw = w_oihw.shape
    w = jnp.transpose(w_oihw, (2, 3, 1, 0)).reshape(kh * kw, ci, co)   # (9, Cin, Cout)
    w = w * scale.reshape(1, 1, co)                                    # fold BN per out-chan
    w = jnp.pad(w, ((0, 0), (0, cin_p - ci), (0, cout_p - co)))
    return w.astype(jnp.bfloat16)


def residual_block_forward(x_nchw, params, stride):
    """Pallas TPU forward of ResidualBlock (inference-mode BN). NCHW in / NCHW out."""
    x = jnp.transpose(x_nchw, (0, 2, 3, 1)).astype(jnp.float32)        # NCHW -> NHWC
    N, H, W, Cin = x.shape
    Cout = params["w1"].shape[0]
    s = int(stride)
    Ho = (H + 2 - 3) // s + 1
    Wo = (W + 2 - 3) // s + 1
    Cip = _round_up(Cin, _LANE)        # lane-dense / MXU-aligned channel padding
    Cop = _round_up(Cout, _LANE)
    has_proj = (s != 1) or (Cin != Cout)

    # Fold BN scales into the conv weights; keep only the f32 bias adds for the kernel.
    s1, b1 = _fold_bn(*params["bn1"])
    s2, b2 = _fold_bn(*params["bn2"])
    w1 = _conv3x3_taps(params["w1"], s1, Cip, Cop)
    w2 = _conv3x3_taps(params["w2"], s2, Cop, Cop)
    b1p = jnp.pad(b1, ((0, 0), (0, Cop - Cout)))
    b2p = jnp.pad(b2, ((0, 0), (0, Cop - Cout)))

    # Channel-pad, spatially zero-pad (conv pad=1) and stride-phase-split the input so the
    # kernel's 9 im2col taps are contiguous (unit-stride) window reads even for stride 2.
    xc = jnp.pad(x, ((0, 0), (0, 0), (0, 0), (0, Cip - Cin)))
    E_h = Ho + 2 // s
    E_w = Wo + 2 // s
    xp = jnp.pad(xc, ((0, 0), (1, s * E_h - H - 1), (1, s * E_w - W - 1), (0, 0)))
    xph = (xp.reshape(N, E_h, s, E_w, s, Cip)
             .transpose(0, 2, 4, 1, 3, 5)
             .reshape(N, s * s * E_h, E_w, Cip))

    if has_proj:
        ss_, bs_ = _fold_bn(*params["bns"])
        xs = xc[:, ::s, ::s, :]                                        # (N, Ho, Wo, Cip)
        ws = jnp.transpose(params["ws"][:, :, 0, 0]) * ss_             # (Cin, Cout), BN folded
        ws = jnp.pad(ws, ((0, Cip - Cin), (0, Cop - Cout))).astype(jnp.bfloat16)
        bsp = jnp.pad(bs_, ((0, 0), (0, Cop - Cout)))
    else:
        xs = xc                                                        # identity shortcut

    inputs = [xph, xs, w1, b1p, w2, b2p]
    in_specs = [
        pl.BlockSpec((1, s * s * E_h, E_w, Cip), lambda b: (b, 0, 0, 0)),
        pl.BlockSpec((1, Ho, Wo, xs.shape[-1]), lambda b: (b, 0, 0, 0)),
        # Constant-index operands: fetched once and reused across the batch grid.
        pl.BlockSpec((9, Cip, Cop), lambda b: (0, 0, 0)),
        pl.BlockSpec((1, Cop), lambda b: (0, 0)),
        pl.BlockSpec((9, Cop, Cop), lambda b: (0, 0, 0)),
        pl.BlockSpec((1, Cop), lambda b: (0, 0)),
    ]
    if has_proj:
        inputs += [ws, bsp]
        in_specs += [pl.BlockSpec((Cip, Cop), lambda b: (0, 0)),
                     pl.BlockSpec((1, Cop), lambda b: (0, 0))]

    M = Ho * Wo
    flops = 2 * N * M * (9 * Cip * Cop + 9 * Cop * Cop + (Cip * Cop if has_proj else 0))
    bytes_accessed = int(sum(a.size * a.dtype.itemsize for a in inputs)
                         + N * Ho * Wo * Cop * 4)

    out = pl.pallas_call(
        functools.partial(_resblock_kernel, stride=s, Ho=Ho, Wo=Wo, E_h=E_h,
                          has_proj=has_proj),
        out_shape=jax.ShapeDtypeStruct((N, Ho, Wo, Cop), jnp.float32),
        grid_spec=pltpu.PrefetchScalarGridSpec(
            num_scalar_prefetch=0,
            grid=(N,),
            in_specs=in_specs,
            out_specs=pl.BlockSpec((1, Ho, Wo, Cop), lambda b: (b, 0, 0, 0)),
            scratch_shapes=[pltpu.VMEM((Ho + 2, Wo + 2, Cop), jnp.float32)],
        ),
        compiler_params=pltpu.CompilerParams(dimension_semantics=("parallel",)),
        cost_estimate=pl.CostEstimate(flops=flops, transcendentals=0,
                                      bytes_accessed=bytes_accessed),
    )(*inputs)

    # TODO(synk): for ResNet-scale feature maps / channel counts, add spatial row tiling and
    # a Cout/K grid axis with a VMEM accumulator, ship activations in bf16, and set
    # vmem_limit_bytes explicitly (v7x has 64 MiB physical, v5e 16 MiB default scoped).
    return jnp.transpose(out[..., :Cout], (0, 3, 1, 2))                # NHWC -> NCHW


# --------------------- reference (precision-matched, pure JAX) --------------------

def residual_block_ref(x_nchw, params, stride):
    """Reference with the kernel's precision policy: bf16 conv operands (BN scale folded),
    f32 accumulation and f32 bias / ReLU / residual add."""
    x = jnp.transpose(x_nchw, (0, 2, 3, 1)).astype(jnp.float32)
    dn = ("NHWC", "HWIO", "NHWC")

    def conv(inp, w_oihw, s, pad):
        w = jnp.transpose(w_oihw, (2, 3, 1, 0))
        return lax.conv_general_dilated(inp, w, (s, s), [(pad, pad), (pad, pad)],
                                        dimension_numbers=dn,
                                        preferred_element_type=jnp.float32)

    s1, b1 = _fold_bn(*params["bn1"])
    s2, b2 = _fold_bn(*params["bn2"])
    w1 = (params["w1"] * s1.reshape(-1, 1, 1, 1)).astype(jnp.bfloat16)
    w2 = (params["w2"] * s2.reshape(-1, 1, 1, 1)).astype(jnp.bfloat16)
    xb = x.astype(jnp.bfloat16)

    y = jnp.maximum(conv(xb, w1, stride, 1) + b1, 0.0)
    y = conv(y.astype(jnp.bfloat16), w2, 1, 1) + b2

    cin, cout = x.shape[-1], params["w1"].shape[0]
    if stride != 1 or cin != cout:
        ss_, bs_ = _fold_bn(*params["bns"])
        ws = (params["ws"] * ss_.reshape(-1, 1, 1, 1)).astype(jnp.bfloat16)
        sc = conv(xb, ws, stride, 0) + bs_
    else:
        sc = x
    return jnp.transpose(jnp.maximum(y + sc, 0.0), (0, 3, 1, 2))


# --------------------------------------- main --------------------------------------

if __name__ == "__main__":
    key = jax.random.PRNGKey(0)

    def bn_params(k, c):
        k0, k1, k2, k3 = jax.random.split(k, 4)
        return (jax.random.uniform(k0, (c,), jnp.float32, 0.5, 1.5),
                0.1 * jax.random.normal(k1, (c,), jnp.float32),
                0.1 * jax.random.normal(k2, (c,), jnp.float32),
                jax.random.uniform(k3, (c,), jnp.float32, 0.5, 1.5))

    def make_params(k, cin, cout, proj):
        ks = jax.random.split(k, 6)
        p = {"w1": 0.1 * jax.random.normal(ks[0], (cout, cin, 3, 3), jnp.float32),
             "bn1": bn_params(ks[1], cout),
             "w2": 0.1 * jax.random.normal(ks[2], (cout, cout, 3, 3), jnp.float32),
             "bn2": bn_params(ks[3], cout)}
        if proj:
            p["ws"] = 0.1 * jax.random.normal(ks[4], (cout, cin, 1, 1), jnp.float32)
            p["bns"] = bn_params(ks[5], cout)
        return p

    fwd = jax.jit(residual_block_forward, static_argnums=(2,))

    # 1) downsampling block: stride 2, Cin != Cout -> projection (1x1 conv + BN) shortcut
    N, Cin, H, W, Cout, stride = 2, 4, 16, 16, 8, 2
    k1, k2, k3, k4 = jax.random.split(key, 4)
    x = jax.random.normal(k1, (N, Cin, H, W), jnp.float32)
    params = make_params(k2, Cin, Cout, True)
    out = jax.block_until_ready(fwd(x, params, stride))
    ref = jax.block_until_ready(residual_block_ref(x, params, stride))
    assert out.shape == (N, Cout, H // stride, W // stride), out.shape
    assert jnp.allclose(out, ref, atol=2e-2, rtol=2e-2), float(jnp.abs(out - ref).max())

    # 2) identity block: stride 1, Cin == Cout -> plain residual add (no projection matmul)
    x2 = jax.random.normal(k3, (N, Cout, H, W), jnp.float32)
    params2 = make_params(k4, Cout, Cout, False)
    out2 = jax.block_until_ready(fwd(x2, params2, 1))
    ref2 = jax.block_until_ready(residual_block_ref(x2, params2, 1))
    assert out2.shape == (N, Cout, H, W), out2.shape
    assert jnp.allclose(out2, ref2, atol=2e-2, rtol=2e-2), float(jnp.abs(out2 - ref2).max())

    print("KERNEL_OK")
</pallas_src>

<mosaic_0001>
module attributes {stable_mosaic.version = 11 : i64} {
  func.func @_resblock_kernel(%arg0: i32, %arg1: memref<1x36x9x128xf32, #tpu.memory_space<vmem>>, %arg2: memref<1x8x8x128xf32, #tpu.memory_space<vmem>>, %arg3: memref<9x128x128xbf16, #tpu.memory_space<vmem>>, %arg4: memref<1x128xf32, #tpu.memory_space<vmem>>, %arg5: memref<9x128x128xbf16, #tpu.memory_space<vmem>>, %arg6: memref<1x128xf32, #tpu.memory_space<vmem>>, %arg7: memref<128x128xbf16, #tpu.memory_space<vmem>>, %arg8: memref<1x128xf32, #tpu.memory_space<vmem>>, %arg9: memref<1x8x8x128xf32, #tpu.memory_space<vmem>>, %arg10: memref<10x10x128xf32, #tpu.memory_space<vmem>>) attributes {dimension_semantics = [#tpu.dimension_semantics<parallel>], iteration_bounds = array<i64: 2>, scalar_prefetch = 0 : i64, scratch_operands = 1 : i64, tpu.core_type = #tpu.core_type<tc>, window_params = [{transform_indices = @transform_0, window_bounds = array<i64: 1, 36, 9, 128>}, {transform_indices = @transform_1, window_bounds = array<i64: 1, 8, 8, 128>}, {pipeline_mode = #tpu.pipeline_mode<synchronous>, transform_indices = @transform_2, window_bounds = array<i64: 9, 128, 128>}, {pipeline_mode = #tpu.pipeline_mode<synchronous>, transform_indices = @transform_3, window_bounds = array<i64: 1, 128>}, {pipeline_mode = #tpu.pipeline_mode<synchronous>, transform_indices = @transform_4, window_bounds = array<i64: 9, 128, 128>}, {pipeline_mode = #tpu.pipeline_mode<synchronous>, transform_indices = @transform_5, window_bounds = array<i64: 1, 128>}, {pipeline_mode = #tpu.pipeline_mode<synchronous>, transform_indices = @transform_6, window_bounds = array<i64: 128, 128>}, {pipeline_mode = #tpu.pipeline_mode<synchronous>, transform_indices = @transform_7, window_bounds = array<i64: 1, 128>}, {transform_indices = @transform_8, window_bounds = array<i64: 1, 8, 8, 128>}]} {
    %cst = arith.constant 0.000000e+00 : f32
    %0 = vector.broadcast %cst : f32 to vector<64x128xf32>
    %c0 = arith.constant 0 : index
    %c0_0 = arith.constant 0 : index
    %c0_1 = arith.constant 0 : index
    %c0_2 = arith.constant 0 : index
    %1 = vector.load %arg1[%c0, %c0_0, %c0_1, %c0_2] : memref<1x36x9x128xf32, #tpu.memory_space<vmem>>, vector<1x8x8x128xf32>
    %2 = vector.shape_cast %1 : vector<1x8x8x128xf32> to vector<8x8x128xf32>
    %3 = vector.shape_cast %2 : vector<8x8x128xf32> to vector<64x128xf32>
    %4 = arith.truncf %3 : vector<64x128xf32> to vector<64x128xbf16>
    %c0_3 = arith.constant 0 : index
    %c0_4 = arith.constant 0 : index
    %c0_5 = arith.constant 0 : index
    %5 = vector.load %arg3[%c0_3, %c0_4, %c0_5] : memref<9x128x128xbf16, #tpu.memory_space<vmem>>, vector<1x128x128xbf16>
    %6 = vector.shape_cast %5 : vector<1x128x128xbf16> to vector<128x128xbf16>
    %cst_6 = arith.constant dense<0.000000e+00> : vector<64x128xf32>
    %7 = tpu.matmul %4, %6, %cst_6 {dimension_numbers = #tpu.dot_dimension_numbers<[1], [0], [0], [1], [0, 0, 1, 1], [], []>} : vector<64x128xbf16>, vector<128x128xbf16>, vector<64x128xf32> -> vector<64x128xf32>
    %8 = arith.addf %0, %7 : vector<64x128xf32>
    %c0_7 = arith.constant 0 : index
    %c9 = arith.constant 9 : index
    %c0_8 = arith.constant 0 : index
    %c0_9 = arith.constant 0 : index
    %9 = vector.load %arg1[%c0_7, %c9, %c0_8, %c0_9] : memref<1x36x9x128xf32, #tpu.memory_space<vmem>>, vector<1x8x8x128xf32>
    %10 = vector.shape_cast %9 : vector<1x8x8x128xf32> to vector<8x8x128xf32>
    %11 = vector.shape_cast %10 : vector<8x8x128xf32> to vector<64x128xf32>
    %12 = arith.truncf %11 : vector<64x128xf32> to vector<64x128xbf16>
    %c1 = arith.constant 1 : index
    %c0_10 = arith.constant 0 : index
    %c0_11 = arith.constant 0 : index
    %13 = vector.load %arg3[%c1, %c0_10, %c0_11] : memref<9x128x128xbf16, #tpu.memory_space<vmem>>, vector<1x128x128xbf16>
    %14 = vector.shape_cast %13 : vector<1x128x128xbf16> to vector<128x128xbf16>
    %cst_12 = arith.constant dense<0.000000e+00> : vector<64x128xf32>
    %15 = tpu.matmul %12, %14, %cst_12 {dimension_numbers = #tpu.dot_dimension_numbers<[1], [0], [0], [1], [0, 0, 1, 1], [], []>} : vector<64x128xbf16>, vector<128x128xbf16>, vector<64x128xf32> -> vector<64x128xf32>
    %16 = arith.addf %8, %15 : vector<64x128xf32>
    %c0_13 = arith.constant 0 : index
    %c0_14 = arith.constant 0 : index
    %c1_15 = arith.constant 1 : index
    %c0_16 = arith.constant 0 : index
    %17 = vector.load %arg1[%c0_13, %c0_14, %c1_15, %c0_16] : memref<1x36x9x128xf32, #tpu.memory_space<vmem>>, vector<1x8x8x128xf32>
    %18 = vector.shape_cast %17 : vector<1x8x8x128xf32> to vector<8x8x128xf32>
    %19 = vector.shape_cast %18 : vector<8x8x128xf32> to vector<64x128xf32>
    %20 = arith.truncf %19 : vector<64x128xf32> to vector<64x128xbf16>
    %c2 = arith.constant 2 : index
    %c0_17 = arith.constant 0 : index
    %c0_18 = arith.constant 0 : index
    %21 = vector.load %arg3[%c2, %c0_17, %c0_18] : memref<9x128x128xbf16, #tpu.memory_space<vmem>>, vector<1x128x128xbf16>
    %22 = vector.shape_cast %21 : vector<1x128x128xbf16> to vector<128x128xbf16>
    %cst_19 = arith.constant dense<0.000000e+00> : vector<64x128xf32>
    %23 = tpu.matmul %20, %22, %cst_19 {dimension_numbers = #tpu.dot_dimension_numbers<[1], [0], [0], [1], [0, 0, 1, 1], [], []>} : vector<64x128xbf16>, vector<128x128xbf16>, vector<64x128xf32> -> vector<64x128xf32>
    %24 = arith.addf %16, %23 : vector<64x128xf32>
    %c0_20 = arith.constant 0 : index
    %c18 = arith.constant 18 : index
    %c0_21 = arith.constant 0 : index
    %c0_22 = arith.constant 0 : index
    %25 = vector.load %arg1[%c0_20, %c18, %c0_21, %c0_22] : memref<1x36x9x128xf32, #tpu.memory_space<vmem>>, vector<1x8x8x128xf32>
    %26 = vector.shape_cast %25 : vector<1x8x8x128xf32> to vector<8x8x128xf32>
    %27 = vector.shape_cast %26 : vector<8x8x128xf32> to vector<64x128xf32>
    %28 = arith.truncf %27 : vector<64x128xf32> to vector<64x128xbf16>
    %c3 = arith.constant 3 : index
    %c0_23 = arith.constant 0 : index
    %c0_24 = arith.constant 0 : index
    %29 = vector.load %arg3[%c3, %c0_23, %c0_24] : memref<9x128x128xbf16, #tpu.memory_space<vmem>>, vector<1x128x128xbf16>
    %30 = vector.shape_cast %29 : vector<1x128x128xbf16> to vector<128x128xbf16>
    %cst_25 = arith.constant dense<0.000000e+00> : vector<64x128xf32>
    %31 = tpu.matmul %28, %30, %cst_25 {dimension_numbers = #tpu.dot_dimension_numbers<[1], [0], [0], [1], [0, 0, 1, 1], [], []>} : vector<64x128xbf16>, vector<128x128xbf16>, vector<64x128xf32> -> vector<64x128xf32>
    %32 = arith.addf %24, %31 : vector<64x128xf32>
    %c0_26 = arith.constant 0 : index
    %c27 = arith.constant 27 : index
    %c0_27 = arith.constant 0 : index
    %c0_28 = arith.constant 0 : index
    %33 = vector.load %arg1[%c0_26, %c27, %c0_27, %c0_28] : memref<1x36x9x128xf32, #tpu.memory_space<vmem>>, vector<1x8x8x128xf32>
    %34 = vector.shape_cast %33 : vector<1x8x8x128xf32> to vector<8x8x128xf32>
    %35 = vector.shape_cast %34 : vector<8x8x128xf32> to vector<64x128xf32>
    %36 = arith.truncf %35 : vector<64x128xf32> to vector<64x128xbf16>
    %c4 = arith.constant 4 : index
    %c0_29 = arith.constant 0 : index
    %c0_30 = arith.constant 0 : index
    %37 = vector.load %arg3[%c4, %c0_29, %c0_30] : memref<9x128x128xbf16, #tpu.memory_space<vmem>>, vector<1x128x128xbf16>
    %38 = vector.shape_cast %37 : vector<1x128x128xbf16> to vector<128x128xbf16>
    %cst_31 = arith.constant dense<0.000000e+00> : vector<64x128xf32>
    %39 = tpu.matmul %36, %38, %cst_31 {dimension_numbers = #tpu.dot_dimension_numbers<[1], [0], [0], [1], [0, 0, 1, 1], [], []>} : vector<64x128xbf16>, vector<128x128xbf16>, vector<64x128xf32> -> vector<64x128xf32>
    %40 = arith.addf %32, %39 : vector<64x128xf32>
    %c0_32 = arith.constant 0 : index
    %c18_33 = arith.constant 18 : index
    %c1_34 = arith.constant 1 : index
    %c0_35 = arith.constant 0 : index
    %41 = vector.load %arg1[%c0_32, %c18_33, %c1_34, %c0_35] : memref<1x36x9x128xf32, #tpu.memory_space<vmem>>, vector<1x8x8x128xf32>
    %42 = vector.shape_cast %41 : vector<1x8x8x128xf32> to vector<8x8x128xf32>
    %43 = vector.shape_cast %42 : vector<8x8x128xf32> to vector<64x128xf32>
    %44 = arith.truncf %43 : vector<64x128xf32> to vector<64x128xbf16>
    %c5 = arith.constant 5 : index
    %c0_36 = arith.constant 0 : index
    %c0_37 = arith.constant 0 : index
    %45 = vector.load %arg3[%c5, %c0_36, %c0_37] : memref<9x128x128xbf16, #tpu.memory_space<vmem>>, vector<1x128x128xbf16>
    %46 = vector.shape_cast %45 : vector<1x128x128xbf16> to vector<128x128xbf16>
    %cst_38 = arith.constant dense<0.000000e+00> : vector<64x128xf32>
    %47 = tpu.matmul %44, %46, %cst_38 {dimension_numbers = #tpu.dot_dimension_numbers<[1], [0], [0], [1], [0, 0, 1, 1], [], []>} : vector<64x128xbf16>, vector<128x128xbf16>, vector<64x128xf32> -> vector<64x128xf32>
    %48 = arith.addf %40, %47 : vector<64x128xf32>
    %c0_39 = arith.constant 0 : index
    %c1_40 = arith.constant 1 : index
    %c0_41 = arith.constant 0 : index
    %c0_42 = arith.constant 0 : index
    %49 = vector.load %arg1[%c0_39, %c1_40, %c0_41, %c0_42] : memref<1x36x9x128xf32, #tpu.memory_space<vmem>>, vector<1x8x8x128xf32>
    %50 = vector.shape_cast %49 : vector<1x8x8x128xf32> to vector<8x8x128xf32>
    %51 = vector.shape_cast %50 : vector<8x8x128xf32> to vector<64x128xf32>
    %52 = arith.truncf %51 : vector<64x128xf32> to vector<64x128xbf16>
    %c6 = arith.constant 6 : index
    %c0_43 = arith.constant 0 : index
    %c0_44 = arith.constant 0 : index
    %53 = vector.load %arg3[%c6, %c0_43, %c0_44] : memref<9x128x128xbf16, #tpu.memory_space<vmem>>, vector<1x128x128xbf16>
    %54 = vector.shape_cast %53 : vector<1x128x128xbf16> to vector<128x128xbf16>
    %cst_45 = arith.constant dense<0.000000e+00> : vector<64x128xf32>
    %55 = tpu.matmul %52, %54, %cst_45 {dimension_numbers = #tpu.dot_dimension_numbers<[1], [0], [0], [1], [0, 0, 1, 1], [], []>} : vector<64x128xbf16>, vector<128x128xbf16>, vector<64x128xf32> -> vector<64x128xf32>
    %56 = arith.addf %48, %55 : vector<64x128xf32>
    %c0_46 = arith.constant 0 : index
    %c10 = arith.constant 10 : index
    %c0_47 = arith.constant 0 : index
    %c0_48 = arith.constant 0 : index
    %57 = vector.load %arg1[%c0_46, %c10, %c0_47, %c0_48] : memref<1x36x9x128xf32, #tpu.memory_space<vmem>>, vector<1x8x8x128xf32>
    %58 = vector.shape_cast %57 : vector<1x8x8x128xf32> to vector<8x8x128xf32>
    %59 = vector.shape_cast %58 : vector<8x8x128xf32> to vector<64x128xf32>
    %60 = arith.truncf %59 : vector<64x128xf32> to vector<64x128xbf16>
    %c7 = arith.constant 7 : index
    %c0_49 = arith.constant 0 : index
    %c0_50 = arith.constant 0 : index
    %61 = vector.load %arg3[%c7, %c0_49, %c0_50] : memref<9x128x128xbf16, #tpu.memory_space<vmem>>, vector<1x128x128xbf16>
    %62 = vector.shape_cast %61 : vector<1x128x128xbf16> to vector<128x128xbf16>
    %cst_51 = arith.constant dense<0.000000e+00> : vector<64x128xf32>
    %63 = tpu.matmul %60, %62, %cst_51 {dimension_numbers = #tpu.dot_dimension_numbers<[1], [0], [0], [1], [0, 0, 1, 1], [], []>} : vector<64x128xbf16>, vector<128x128xbf16>, vector<64x128xf32> -> vector<64x128xf32>
    %64 = arith.addf %56, %63 : vector<64x128xf32>
    %c0_52 = arith.constant 0 : index
    %c1_53 = arith.constant 1 : index
    %c1_54 = arith.constant 1 : index
    %c0_55 = arith.constant 0 : index
    %65 = vector.load %arg1[%c0_52, %c1_53, %c1_54, %c0_55] : memref<1x36x9x128xf32, #tpu.memory_space<vmem>>, vector<1x8x8x128xf32>
    %66 = vector.shape_cast %65 : vector<1x8x8x128xf32> to vector<8x8x128xf32>
    %67 = vector.shape_cast %66 : vector<8x8x128xf32> to vector<64x128xf32>
    %68 = arith.truncf %67 : vector<64x128xf32> to vector<64x128xbf16>
    %c8 = arith.constant 8 : index
    %c0_56 = arith.constant 0 : index
    %c0_57 = arith.constant 0 : index
    %69 = vector.load %arg3[%c8, %c0_56, %c0_57] : memref<9x128x128xbf16, #tpu.memory_space<vmem>>, vector<1x128x128xbf16>
    %70 = vector.shape_cast %69 : vector<1x128x128xbf16> to vector<128x128xbf16>
    %cst_58 = arith.constant dense<0.000000e+00> : vector<64x128xf32>
    %71 = tpu.matmul %68, %70, %cst_58 {dimension_numbers = #tpu.dot_dimension_numbers<[1], [0], [0], [1], [0, 0, 1, 1], [], []>} : vector<64x128xbf16>, vector<128x128xbf16>, vector<64x128xf32> -> vector<64x128xf32>
    %72 = arith.addf %64, %71 : vector<64x128xf32>
    %c0_59 = arith.constant 0 : index
    %c0_60 = arith.constant 0 : index
    %73 = vector.load %arg4[%c0_59, %c0_60] : memref<1x128xf32, #tpu.memory_space<vmem>>, vector<1x128xf32>
    %74 = vector.broadcast %73 : vector<1x128xf32> to vector<64x128xf32>
    %75 = arith.addf %72, %74 : vector<64x128xf32>
    %cst_61 = arith.constant 0.000000e+00 : f32
    %76 = vector.broadcast %cst_61 : f32 to vector<64x128xf32>
    %77 = arith.maximumf %75, %76 : vector<64x128xf32>
    %cst_62 = arith.constant 0.000000e+00 : f32
    %78 = vector.broadcast %cst_62 : f32 to vector<10x10x128xf32>
    %c0_63 = arith.constant 0 : index
    %c0_64 = arith.constant 0 : index
    %c0_65 = arith.constant 0 : index
    %79 = vector.load %arg10[%c0_63, %c0_64, %c0_65] : memref<10x10x128xf32, #tpu.memory_space<vmem>>, vector<10x10x128xf32>
    tpu.vector_store %arg10[%c0_63, %c0_64, %c0_65], %78 {strides = array<i32>} : memref<10x10x128xf32, #tpu.memory_space<vmem>>, vector<10x10x128xf32>,
    %80 = vector.shape_cast %77 : vector<64x128xf32> to vector<8x8x128xf32>
    %c1_66 = arith.constant 1 : index
    %c1_67 = arith.constant 1 : index
    %c0_68 = arith.constant 0 : index
    %81 = vector.load %arg10[%c1_66, %c1_67, %c0_68] : memref<10x10x128xf32, #tpu.memory_space<vmem>>, vector<8x8x128xf32>
    tpu.vector_store %arg10[%c1_66, %c1_67, %c0_68], %80 {strides = array<i32>} : memref<10x10x128xf32, #tpu.memory_space<vmem>>, vector<8x8x128xf32>,
    %cst_69 = arith.constant 0.000000e+00 : f32
    %82 = vector.broadcast %cst_69 : f32 to vector<64x128xf32>
    %c0_70 = arith.constant 0 : index
    %c0_71 = arith.constant 0 : index
    %c0_72 = arith.constant 0 : index
    %83 = vector.load %arg10[%c0_70, %c0_71, %c0_72] : memref<10x10x128xf32, #tpu.memory_space<vmem>>, vector<8x8x128xf32>
    %84 = vector.shape_cast %83 : vector<8x8x128xf32> to vector<64x128xf32>
    %85 = arith.truncf %84 : vector<64x128xf32> to vector<64x128xbf16>
    %c0_73 = arith.constant 0 : index
    %c0_74 = arith.constant 0 : index
    %c0_75 = arith.constant 0 : index
    %86 = vector.load %arg5[%c0_73, %c0_74, %c0_75] : memref<9x128x128xbf16, #tpu.memory_space<vmem>>, vector<1x128x128xbf16>
    %87 = vector.shape_cast %86 : vector<1x128x128xbf16> to vector<128x128xbf16>
    %cst_76 = arith.constant dense<0.000000e+00> : vector<64x128xf32>
    %88 = tpu.matmul %85, %87, %cst_76 {dimension_numbers = #tpu.dot_dimension_numbers<[1], [0], [0], [1], [0, 0, 1, 1], [], []>} : vector<64x128xbf16>, vector<128x128xbf16>, vector<64x128xf32> -> vector<64x128xf32>
    %89 = arith.addf %82, %88 : vector<64x128xf32>
    %c0_77 = arith.constant 0 : index
    %c1_78 = arith.constant 1 : index
    %c0_79 = arith.constant 0 : index
    %90 = vector.load %arg10[%c0_77, %c1_78, %c0_79] : memref<10x10x128xf32, #tpu.memory_space<vmem>>, vector<8x8x128xf32>
    %91 = vector.shape_cast %90 : vector<8x8x128xf32> to vector<64x128xf32>
    %92 = arith.truncf %91 : vector<64x128xf32> to vector<64x128xbf16>
    %c1_80 = arith.constant 1 : index
    %c0_81 = arith.constant 0 : index
    %c0_82 = arith.constant 0 : index
    %93 = vector.load %arg5[%c1_80, %c0_81, %c0_82] : memref<9x128x128xbf16, #tpu.memory_space<vmem>>, vector<1x128x128xbf16>
    %94 = vector.shape_cast %93 : vector<1x128x128xbf16> to vector<128x128xbf16>
    %cst_83 = arith.constant dense<0.000000e+00> : vector<64x128xf32>
    %95 = tpu.matmul %92, %94, %cst_83 {dimension_numbers = #tpu.dot_dimension_numbers<[1], [0], [0], [1], [0, 0, 1, 1], [], []>} : vector<64x128xbf16>, vector<128x128xbf16>, vector<64x128xf32> -> vector<64x128xf32>
    %96 = arith.addf %89, %95 : vector<64x128xf32>
    %c0_84 = arith.constant 0 : index
    %c2_85 = arith.constant 2 : index
    %c0_86 = arith.constant 0 : index
    %97 = vector.load %arg10[%c0_84, %c2_85, %c0_86] : memref<10x10x128xf32, #tpu.memory_space<vmem>>, vector<8x8x128xf32>
    %98 = vector.shape_cast %97 : vector<8x8x128xf32> to vector<64x128xf32>
    %99 = arith.truncf %98 : vector<64x128xf32> to vector<64x128xbf16>
    %c2_87 = arith.constant 2 : index
    %c0_88 = arith.constant 0 : index
    %c0_89 = arith.constant 0 : index
    %100 = vector.load %arg5[%c2_87, %c0_88, %c0_89] : memref<9x128x128xbf16, #tpu.memory_space<vmem>>, vector<1x128x128xbf16>
    %101 = vector.shape_cast %100 : vector<1x128x128xbf16> to vector<128x128xbf16>
    %cst_90 = arith.constant dense<0.000000e+00> : vector<64x128xf32>
    %102 = tpu.matmul %99, %101, %cst_90 {dimension_numbers = #tpu.dot_dimension_numbers<[1], [0], [0], [1], [0, 0, 1, 1], [], []>} : vector<64x128xbf16>, vector<128x128xbf16>, vector<64x128xf32> -> vector<64x128xf32>
    %103 = arith.addf %96, %102 : vector<64x128xf32>
    %c1_91 = arith.constant 1 : index
    %c0_92 = arith.constant 0 : index
    %c0_93 = arith.constant 0 : index
    %104 = vector.load %arg10[%c1_91, %c0_92, %c0_93] : memref<10x10x128xf32, #tpu.memory_space<vmem>>, vector<8x8x128xf32>
    %105 = vector.shape_cast %104 : vector<8x8x128xf32> to vector<64x128xf32>
    %106 = arith.truncf %105 : vector<64x128xf32> to vector<64x128xbf16>
    %c3_94 = arith.constant 3 : index
    %c0_95 = arith.constant 0 : index
    %c0_96 = arith.constant 0 : index
    %107 = vector.load %arg5[%c3_94, %c0_95, %c0_96] : memref<9x128x128xbf16, #tpu.memory_space<vmem>>, vector<1x128x128xbf16>
    %108 = vector.shape_cast %107 : vector<1x128x128xbf16> to vector<128x128xbf16>
    %cst_97 = arith.constant dense<0.000000e+00> : vector<64x128xf32>
    %109 = tpu.matmul %106, %108, %cst_97 {dimension_numbers = #tpu.dot_dimension_numbers<[1], [0], [0], [1], [0, 0, 1, 1], [], []>} : vector<64x128xbf16>, vector<128x128xbf16>, vector<64x128xf32> -> vector<64x128xf32>
    %110 = arith.addf %103, %109 : vector<64x128xf32>
    %c1_98 = arith.constant 1 : index
    %c1_99 = arith.constant 1 : index
    %c0_100 = arith.constant 0 : index
    %111 = vector.load %arg10[%c1_98, %c1_99, %c0_100] : memref<10x10x128xf32, #tpu.memory_space<vmem>>, vector<8x8x128xf32>
    %112 = vector.shape_cast %111 : vector<8x8x128xf32> to vector<64x128xf32>
    %113 = arith.truncf %112 : vector<64x128xf32> to vector<64x128xbf16>
    %c4_101 = arith.constant 4 : index
    %c0_102 = arith.constant 0 : index
    %c0_103 = arith.constant 0 : index
    %114 = vector.load %arg5[%c4_101, %c0_102, %c0_103] : memref<9x128x128xbf16, #tpu.memory_space<vmem>>, vector<1x128x128xbf16>
    %115 = vector.shape_cast %114 : vector<1x128x128xbf16> to vector<128x128xbf16>
    %cst_104 = arith.constant dense<0.000000e+00> : vector<64x128xf32>
    %116 = tpu.matmul %113, %115, %cst_104 {dimension_numbers = #tpu.dot_dimension_numbers<[1], [0], [0], [1], [0, 0, 1, 1], [], []>} : vector<64x128xbf16>, vector<128x128xbf16>, vector<64x128xf32> -> vector<64x128xf32>
    %117 = arith.addf %110, %116 : vector<64x128xf32>
    %c1_105 = arith.constant 1 : index
    %c2_106 = arith.constant 2 : index
    %c0_107 = arith.constant 0 : index
    %118 = vector.load %arg10[%c1_105, %c2_106, %c0_107] : memref<10x10x128xf32, #tpu.memory_space<vmem>>, vector<8x8x128xf32>
    %119 = vector.shape_cast %118 : vector<8x8x128xf32> to vector<64x128xf32>
    %120 = arith.truncf %119 : vector<64x128xf32> to vector<64x128xbf16>
    %c5_108 = arith.constant 5 : index
    %c0_109 = arith.constant 0 : index
    %c0_110 = arith.constant 0 : index
    %121 = vector.load %arg5[%c5_108, %c0_109, %c0_110] : memref<9x128x128xbf16, #tpu.memory_space<vmem>>, vector<1x128x128xbf16>
    %122 = vector.shape_cast %121 : vector<1x128x128xbf16> to vector<128x128xbf16>
    %cst_111 = arith.constant dense<0.000000e+00> : vector<64x128xf32>
    %123 = tpu.matmul %120, %122, %cst_111 {dimension_numbers = #tpu.dot_dimension_numbers<[1], [0], [0], [1], [0, 0, 1, 1], [], []>} : vector<64x128xbf16>, vector<128x128xbf16>, vector<64x128xf32> -> vector<64x128xf32>
    %124 = arith.addf %117, %123 : vector<64x128xf32>
    %c2_112 = arith.constant 2 : index
    %c0_113 = arith.constant 0 : index
    %c0_114 = arith.constant 0 : index
    %125 = vector.load %arg10[%c2_112, %c0_113, %c0_114] : memref<10x10x128xf32, #tpu.memory_space<vmem>>, vector<8x8x128xf32>
    %126 = vector.shape_cast %125 : vector<8x8x128xf32> to vector<64x128xf32>
    %127 = arith.truncf %126 : vector<64x128xf32> to vector<64x128xbf16>
    %c6_115 = arith.constant 6 : index
    %c0_116 = arith.constant 0 : index
    %c0_117 = arith.constant 0 : index
    %128 = vector.load %arg5[%c6_115, %c0_116, %c0_117] : memref<9x128x128xbf16, #tpu.memory_space<vmem>>, vector<1x128x128xbf16>
    %129 = vector.shape_cast %128 : vector<1x128x128xbf16> to vector<128x128xbf16>
    %cst_118 = arith.constant dense<0.000000e+00> : vector<64x128xf32>
    %130 = tpu.matmul %127, %129, %cst_118 {dimension_numbers = #tpu.dot_dimension_numbers<[1], [0], [0], [1], [0, 0, 1, 1], [], []>} : vector<64x128xbf16>, vector<128x128xbf16>, vector<64x128xf32> -> vector<64x128xf32>
    %131 = arith.addf %124, %130 : vector<64x128xf32>
    %c2_119 = arith.constant 2 : index
    %c1_120 = arith.constant 1 : index
    %c0_121 = arith.constant 0 : index
    %132 = vector.load %arg10[%c2_119, %c1_120, %c0_121] : memref<10x10x128xf32, #tpu.memory_space<vmem>>, vector<8x8x128xf32>
    %133 = vector.shape_cast %132 : vector<8x8x128xf32> to vector<64x128xf32>
    %134 = arith.truncf %133 : vector<64x128xf32> to vector<64x128xbf16>
    %c7_122 = arith.constant 7 : index
    %c0_123 = arith.constant 0 : index
    %c0_124 = arith.constant 0 : index
    %135 = vector.load %arg5[%c7_122, %c0_123, %c0_124] : memref<9x128x128xbf16, #tpu.memory_space<vmem>>, vector<1x128x128xbf16>
    %136 = vector.shape_cast %135 : vector<1x128x128xbf16> to vector<128x128xbf16>
    %cst_125 = arith.constant dense<0.000000e+00> : vector<64x128xf32>
    %137 = tpu.matmul %134, %136, %cst_125 {dimension_numbers = #tpu.dot_dimension_numbers<[1], [0], [0], [1], [0, 0, 1, 1], [], []>} : vector<64x128xbf16>, vector<128x128xbf16>, vector<64x128xf32> -> vector<64x128xf32>
    %138 = arith.addf %131, %137 : vector<64x128xf32>
    %c2_126 = arith.constant 2 : index
    %c2_127 = arith.constant 2 : index
    %c0_128 = arith.constant 0 : index
    %139 = vector.load %arg10[%c2_126, %c2_127, %c0_128] : memref<10x10x128xf32, #tpu.memory_space<vmem>>, vector<8x8x128xf32>
    %140 = vector.shape_cast %139 : vector<8x8x128xf32> to vector<64x128xf32>
    %141 = arith.truncf %140 : vector<64x128xf32> to vector<64x128xbf16>
    %c8_129 = arith.constant 8 : index
    %c0_130 = arith.constant 0 : index
    %c0_131 = arith.constant 0 : index
    %142 = vector.load %arg5[%c8_129, %c0_130, %c0_131] : memref<9x128x128xbf16, #tpu.memory_space<vmem>>, vector<1x128x128xbf16>
    %143 = vector.shape_cast %142 : vector<1x128x128xbf16> to vector<128x128xbf16>
    %cst_132 = arith.constant dense<0.000000e+00> : vector<64x128xf32>
    %144 = tpu.matmul %141, %143, %cst_132 {dimension_numbers = #tpu.dot_dimension_numbers<[1], [0], [0], [1], [0, 0, 1, 1], [], []>} : vector<64x128xbf16>, vector<128x128xbf16>, vector<64x128xf32> -> vector<64x128xf32>
    %145 = arith.addf %138, %144 : vector<64x128xf32>
    %c0_133 = arith.constant 0 : index
    %c0_134 = arith.constant 0 : index
    %146 = vector.load %arg6[%c0_133, %c0_134] : memref<1x128xf32, #tpu.memory_space<vmem>>, vector<1x128xf32>
    %147 = vector.broadcast %146 : vector<1x128xf32> to vector<64x128xf32>
    %148 = arith.addf %145, %147 : vector<64x128xf32>
    %c0_135 = arith.constant 0 : index
    %c0_136 = arith.constant 0 : index
    %c0_137 = arith.constant 0 : index
    %c0_138 = arith.constant 0 : index
    %149 = vector.load %arg2[%c0_135, %c0_136, %c0_137, %c0_138] : memref<1x8x8x128xf32, #tpu.memory_space<vmem>>, vector<1x8x8x128xf32>
    %150 = vector.shape_cast %149 : vector<1x8x8x128xf32> to vector<64x128xf32>
    %151 = arith.truncf %150 : vector<64x128xf32> to vector<64x128xbf16>
    %c0_139 = arith.constant 0 : index
    %c0_140 = arith.constant 0 : index
    %152 = vector.load %arg7[%c0_139, %c0_140] : memref<128x128xbf16, #tpu.memory_space<vmem>>, vector<128x128xbf16>
    %cst_141 = arith.constant dense<0.000000e+00> : vector<64x128xf32>
    %153 = tpu.matmul %151, %152, %cst_141 {dimension_numbers = #tpu.dot_dimension_numbers<[1], [0], [0], [1], [0, 0, 1, 1], [], []>} : vector<64x128xbf16>, vector<128x128xbf16>, vector<64x128xf32> -> vector<64x128xf32>
    %c0_142 = arith.constant 0 : index
    %c0_143 = arith.constant 0 : index
    %154 = vector.load %arg8[%c0_142, %c0_143] : memref<1x128xf32, #tpu.memory_space<vmem>>, vector<1x128xf32>
    %155 = vector.broadcast %154 : vector<1x128xf32> to vector<64x128xf32>
    %156 = arith.addf %153, %155 : vector<64x128xf32>
    %157 = arith.addf %148, %156 : vector<64x128xf32>
    %cst_144 = arith.constant 0.000000e+00 : f32
    %158 = vector.broadcast %cst_144 : f32 to vector<64x128xf32>
    %159 = arith.maximumf %157, %158 : vector<64x128xf32>
    %160 = vector.shape_cast %159 : vector<64x128xf32> to vector<1x8x8x128xf32>
    %c0_145 = arith.constant 0 : index
    %c0_146 = arith.constant 0 : index
    %c0_147 = arith.constant 0 : index
    %c0_148 = arith.constant 0 : index
    %161 = vector.load %arg9[%c0_145, %c0_146, %c0_147, %c0_148] : memref<1x8x8x128xf32, #tpu.memory_space<vmem>>, vector<1x8x8x128xf32>
    tpu.vector_store %arg9[%c0_145, %c0_146, %c0_147, %c0_148], %160 {strides = array<i32>} : memref<1x8x8x128xf32, #tpu.memory_space<vmem>>, vector<1x8x8x128xf32>,
    return
  }
  func.func @transform_0(%arg0: i32) -> (i32, i32, i32, i32) {
    %c0_i32 = arith.constant 0 : i32
    %c0_i32_0 = arith.constant 0 : i32
    %c0_i32_1 = arith.constant 0 : i32
    %c0_i32_2 = arith.constant 0 : i32
    return %arg0, %c0_i32, %c0_i32_0, %c0_i32_1 : i32, i32, i32, i32
  }
  func.func @transform_1(%arg0: i32) -> (i32, i32, i32, i32) {
    %c0_i32 = arith.constant 0 : i32
    %c0_i32_0 = arith.constant 0 : i32
    %c0_i32_1 = arith.constant 0 : i32
    %c0_i32_2 = arith.constant 0 : i32
    return %arg0, %c0_i32, %c0_i32_0, %c0_i32_1 : i32, i32, i32, i32
  }
  func.func @transform_2(%arg0: i32) -> (i32, i32, i32) {
    %c0_i32 = arith.constant 0 : i32
    %c0_i32_0 = arith.constant 0 : i32
    %c0_i32_1 = arith.constant 0 : i32
    %c0_i32_2 = arith.constant 0 : i32
    return %c0_i32, %c0_i32_0, %c0_i32_1 : i32, i32, i32
  }
  func.func @transform_3(%arg0: i32) -> (i32, i32) {
    %c0_i32 = arith.constant 0 : i32
    %c0_i32_0 = arith.constant 0 : i32
    %c0_i32_1 = arith.constant 0 : i32
    return %c0_i32, %c0_i32_0 : i32, i32
  }
  func.func @transform_4(%arg0: i32) -> (i32, i32, i32) {
    %c0_i32 = arith.constant 0 : i32
    %c0_i32_0 = arith.constant 0 : i32
    %c0_i32_1 = arith.constant 0 : i32
    %c0_i32_2 = arith.constant 0 : i32
    return %c0_i32, %c0_i32_0, %c0_i32_1 : i32, i32, i32
  }
  func.func @transform_5(%arg0: i32) -> (i32, i32) {
    %c0_i32 = arith.constant 0 : i32
    %c0_i32_0 = arith.constant 0 : i32
    %c0_i32_1 = arith.constant 0 : i32
    return %c0_i32, %c0_i32_0 : i32, i32
  }
  func.func @transform_6(%arg0: i32) -> (i32, i32) {
    %c0_i32 = arith.constant 0 : i32
    %c0_i32_0 = arith.constant 0 : i32
    %c0_i32_1 = arith.constant 0 : i32
    return %c0_i32, %c0_i32_0 : i32, i32
  }
  func.func @transform_7(%arg0: i32) -> (i32, i32) {
    %c0_i32 = arith.constant 0 : i32
    %c0_i32_0 = arith.constant 0 : i32
    %c0_i32_1 = arith.constant 0 : i32
    return %c0_i32, %c0_i32_0 : i32, i32
  }
  func.func @transform_8(%arg0: i32) -> (i32, i32, i32, i32) {
    %c0_i32 = arith.constant 0 : i32
    %c0_i32_0 = arith.constant 0 : i32
    %c0_i32_1 = arith.constant 0 : i32
    %c0_i32_2 = arith.constant 0 : i32
    return %arg0, %c0_i32, %c0_i32_0, %c0_i32_1 : i32, i32, i32, i32
  }
}

</mosaic_0001>

<bundles_post_ra>
// kernel: residual_block_forward.1
= control target key start
LH: loop header
LB: loop body
LE: loop exit
PB: predicated region body
PF: predicated region fallthrough
CT: control target
= control target key end

     0   :  { %s4861_s27 = smov 0   ;;  %s5707_s0 = inlined_call_operand.vmem [shape: f32[2,36,9,128], index: 0, kind: input, shape index: {}]   ;;  %s5708_s1 = inlined_call_operand.vmem [shape: f32[2,8,8,128], index: 1, kind: input, shape index: {}]   ;;  %s5709_s2 = inlined_call_operand.vmem [shape: bf16[9,128,128], index: 2, kind: input, shape index: {}]   ;;  %s5710_s3 = inlined_call_operand.vmem [shape: f32[1,128], index: 3, kind: input, shape index: {}]   ;;  %s5711_s4 = inlined_call_operand.vmem [shape: bf16[9,128,128], index: 4, kind: input, shape index: {}]   ;;  %s5712_s5 = inlined_call_operand.vmem [shape: f32[1,128], index: 5, kind: input, shape index: {}]   ;;  %s5713_s6 = inlined_call_operand.vmem [shape: bf16[128,128], index: 6, kind: input, shape index: {}]   ;;  %s5714_s7 = inlined_call_operand.vmem [shape: f32[1,128], index: 7, kind: input, shape index: {}]   ;;  %s5715_s8 = inlined_call_operand.vmem [shape: f32[2,8,8,128], index: 8, kind: output, shape index: {}]  }
   0x1 LB: > { %s3305_s28 = sadd.s32 4294967295, %s4813_s27   ;;  %p3309_p0 = scmp.ge.s32.totalorder %s4813_s27, 1  ;;  %s4813_s27 = sphi %s4861_s27, %s18_s27  }
   0x2   : > { %p272_p1 = scmp.lt.s32.totalorder %s4813_s27, 3 }
   0x4   : > { %p273_p2 = pnand %p3309_p0, %p272_p1 }
   0x5   : > { %v4648_v0 = vld [vmem:[%s5709_s2 + $0x40] sm:$0xff] (!%p273_p2)   ;;  %p311_p3 = scmp.lt.s32.totalorder (!%p273_p2), %s3305_s28, 1  ;;  %v4649_v1 = vld [vmem:[%s5709_s2 + $0x48] sm:$0xff] (!%p273_p2)   ;;  %v4650_v2 = vld [vmem:[%s5709_s2 + $0x50] sm:$0xff] (!%p273_p2)  }
   0x6   : > { %276 = sbr.rel (%p273_p2) target bundleno = 1023 (0x3ff), region = 52  ;;  %4014 = vmatprep.subr.bf16.mxu0 (!%p273_p2), %v4648_v0  ;;  %v4651_v3 = vld [vmem:[%s5709_s2 + $0x58] sm:$0xff] (!%p273_p2)   ;;  %v4652_v7 = vld [vmem:[%s5709_s2 + $0x60] sm:$0xff] (!%p273_p2)   ;;  %v4653_v8 = vld [vmem:[%s5709_s2 + $0x68] sm:$0xff] (!%p273_p2)  }
   0x7   : > { %4015 = vmatpush3.bf16.msra.mxu0 (!%p273_p2), %v4648_v0  ;;  %v4654_v9 = vld [vmem:[%s5709_s2 + $0x70] sm:$0xff] (!%p273_p2)   ;;  %v4655_v10 = vld [vmem:[%s5709_s2 + $0x78] sm:$0xff] (!%p273_p2)   ;;  %v4656_v11 = vld [vmem:[%s5709_s2] sm:$0xff] (!%p273_p2)  }
   0x8   : > { %4016 = vmatprep.subr.bf16.mxu0 (!%p273_p2), %v4649_v1  ;;  %v4657_v18 = vld [vmem:[%s5709_s2 + $0x8] sm:$0xff] (!%p273_p2)   ;;  %v4658_v19 = vld [vmem:[%s5709_s2 + $0x10] sm:$0xff] (!%p273_p2)   ;;  %v4659_v26 = vld [vmem:[%s5709_s2 + $0x18] sm:$0xff] (!%p273_p2)  }
   0x9   : > { %v4660_v27 = vld [vmem:[%s5709_s2 + $0x20] sm:$0xff] (!%p273_p2)   ;;  %v4661_v28 = vld [vmem:[%s5709_s2 + $0x28] sm:$0xff] (!%p273_p2)   ;;  %v4662_v29 = vld [vmem:[%s5709_s2 + $0x30] sm:$0xff] (!%p273_p2)  }
   0xa   : > { %v4663_v30 = vld [vmem:[%s5709_s2 + $0x38] sm:$0xff] (!%p273_p2)   ;;  %v4664_v31 = vld [vmem:[%s5709_s2 + $0x80] sm:$0xff] (!%p273_p2)   ;;  %v4665_v38 = vld [vmem:[%s5709_s2 + $0x88] sm:$0xff] (!%p273_p2)  }
   0xb   : > { %4017 = vmatpush3.bf16.msra.mxu0 (!%p273_p2), %v4649_v1  ;;  %v4666_v41 = vld [vmem:[%s5709_s2 + $0x90] sm:$0xff] (!%p273_p2)   ;;  %v4667_v45 = vld [vmem:[%s5709_s2 + $0x98] sm:$0xff] (!%p273_p2)   ;;  %v4668_v47 = vld [vmem:[%s5709_s2 + $0xa0] sm:$0xff] (!%p273_p2)  }
   0xc   : > { %4018 = vmatprep.subr.bf16.mxu0 (!%p273_p2), %v4650_v2  ;;  %v4669_v48 = vld [vmem:[%s5709_s2 + $0xa8] sm:$0xff] (!%p273_p2)   ;;  %v4670_v49 = vld [vmem:[%s5709_s2 + $0xb0] sm:$0xff] (!%p273_p2)   ;;  %v4671_v50 = vld [vmem:[%s5709_s2 + $0xb8] sm:$0xff] (!%p273_p2)  }
   0xd   : > { %s5717_s28 = smov (!%p311_p3, %s3305_s28), 1  ;;  %v4672_v53 = vld [vmem:[%s5709_s2 + $0xc0] sm:$0xff]   ;;  %v4673_v57 = vld [vmem:[%s5709_s2 + $0xc8] sm:$0xff]   ;;  %v4674_v61 = vld [vmem:[%s5709_s2 + $0xd0] sm:$0xff]  }
   0xe   : > { %s4638_s13 = smul.u32 576, %s5717_s28  ;;  %v4675_v1 = vld [vmem:[%s5709_s2 + $0xd8] sm:$0xff]   ;;  %s3784_s22 = sshll.u32 %s5717_s28, 6 }
   0xf   : > { %4019 = vmatpush3.bf16.msra.mxu0 %v4650_v2  ;;  %s5537_s25 = scalar_lea.vmem %s5708_s1, %s3784_s22  ;;  %s325_s19 = scalar_lea.vmem %s5715_s8, %s3784_s22 }
  0x10   : > { %s4884_s16 = scalar_lea.vmem %s5707_s0, %s4638_s13  ;;  %4020 = vmatprep.subr.bf16.mxu0 %v4651_v3 }
  0x11   : > { %v3315_v4 = vld [vmem:[%s4884_s16 + $0x90] sm:$0xff]  ;;  %v3316_v5 = vld [vmem:[%s4884_s16 + $0xa0] sm:$0xff] }
  0x12   : > { %v364_v6 = vpack.c.bf16 %v3316_v5, %v3315_v4  ;;  %v3317_v12 = vld [vmem:[%s4884_s16 + $0xb0] sm:$0xff]  ;;  %v3318_v13 = vld [vmem:[%s4884_s16 + $0xc0] sm:$0xff]  ;;  %v4677_v4 = vld [vmem:[%s5709_s2 + $0xe8] sm:$0xff]  }
  0x13   : > { %4021 = vmatpush3.bf16.msra.mxu0 %v4651_v3  ;;  %v3319_v14 = vld [vmem:[%s4884_s16 + $0xd0] sm:$0xff]  ;;  %v3320_v15 = vld [vmem:[%s4884_s16 + $0xe0] sm:$0xff]  ;;  %v365_v16 = vpack.c.bf16 %v3318_v13, %v3317_v12  ;;  %v4681_v13 = vld [vmem:[%s5709_s2 + $0x108] sm:$0xff]  }
  0x14   : > { %4030 = vmatprep.mubr.bf16.mxu0 %v364_v6  ;;  %4022 = vmatprep.subr.bf16.mxu0 %v4652_v7  ;;  %v366_v17 = vpack.c.bf16 %v3320_v15, %v3319_v14  ;;  %v3321_v20 = vld [vmem:[%s4884_s16 + $0xf0] sm:$0xff]  ;;  %v3322_v21 = vld [vmem:[%s4884_s16 + $0x100] sm:$0xff]  ;;  %v4679_v6 = vld [vmem:[%s5709_s2 + $0xf8] sm:$0xff]  }
  0x15   : > { %v327_v22 = vld [vmem:[%s4884_s16] sm:$0xff]  ;;  %v4920_v23 = vld [vmem:[%s4884_s16 + $0x10] sm:$0xff]  ;;  %v367_v24 = vpack.c.bf16 %v3322_v21, %v3321_v20  ;;  %v4683_v21 = vld [vmem:[%s5709_s2 + $0x118] sm:$0xff]  }
  0x16   : > { %v335_v25 = vpack.c.bf16 %v4920_v23, %v327_v22  ;;  %v4942_v32 = vld [vmem:[%s4884_s16 + $0x20] sm:$0xff]  ;;  %v4945_v33 = vld [vmem:[%s4884_s16 + $0x30] sm:$0xff] }
  0x17   : > { %4023 = vmatpush3.bf16.msra.mxu0 %v4652_v7  ;;  %v4948_v34 = vld [vmem:[%s4884_s16 + $0x40] sm:$0xff]  ;;  %v4951_v35 = vld [vmem:[%s4884_s16 + $0x50] sm:$0xff]  ;;  %v336_v36 = vpack.c.bf16 %v4945_v33, %v4942_v32 }
  0x18   : > { %4024 = vmatprep.subr.bf16.mxu0 %v4653_v8  ;;  %v337_v37 = vpack.c.bf16 %v4951_v35, %v4948_v34  ;;  %v4961_v39 = vld [vmem:[%s4884_s16 + $0x60] sm:$0xff]  ;;  %v4964_v40 = vld [vmem:[%s4884_s16 + $0x70] sm:$0xff] }
  0x19   : > { %v611_v42 = vld [vmem:[%s4884_s16 + $0x1] sm:$0xff]  ;;  %v4971_v43 = vld [vmem:[%s4884_s16 + $0x11] sm:$0xff]  ;;  %v338_v44 = vpack.c.bf16 %v4964_v40, %v4961_v39 }
  0x1a   : > { %v619_v46 = vpack.c.bf16 %v4971_v43, %v611_v42  ;;  %v4992_v51 = vld [vmem:[%s4884_s16 + $0x21] sm:$0xff]  ;;  %v4995_v52 = vld [vmem:[%s4884_s16 + $0x31] sm:$0xff] }
  0x1b   : > { %4025 = vmatpush3.bf16.msra.mxu0 %v4653_v8  ;;  %v5001_v54 = vld [vmem:[%s4884_s16 + $0x41] sm:$0xff]  ;;  %v5004_v55 = vld [vmem:[%s4884_s16 + $0x51] sm:$0xff]  ;;  %v620_v56 = vpack.c.bf16 %v4995_v52, %v4992_v51 }
  0x1c   : > { %4026 = vmatprep.subr.bf16.mxu0 %v4654_v9  ;;  %v621_v58 = vpack.c.bf16 %v5004_v55, %v5001_v54  ;;  %v5014_v59 = vld [vmem:[%s4884_s16 + $0x61] sm:$0xff]  ;;  %v5017_v60 = vld [vmem:[%s4884_s16 + $0x71] sm:$0xff] }
  0x1d   : > { %v3379_v62 = vld [vmem:[%s4884_s16 + $0x120] sm:$0xff]  ;;  %v3380_v63 = vld [vmem:[%s4884_s16 + $0x130] sm:$0xff]  ;;  %v622_v0 = vpack.c.bf16 %v5017_v60, %v5014_v59 }
  0x1e   : > { %v770_v2 = vpack.c.bf16 %v3380_v63, %v3379_v62  ;;  %v4676_v3 = vld [vmem:[%s5709_s2 + $0xe0] sm:$0xff]   ;;  %v4678_v5 = vld [vmem:[%s5709_s2 + $0xf0] sm:$0xff]   ;;  %v4723_v62 = vld [vmem:[%s5711_s4 + $0x58] sm:$0xff]  }
  0x1f   : > { %4027 = vmatpush3.bf16.msra.mxu0 %v4654_v9  ;;  %v3381_v7 = vld [vmem:[%s4884_s16 + $0x140] sm:$0xff]  ;;  %v3382_v8 = vld [vmem:[%s4884_s16 + $0x150] sm:$0xff] }
  0x20   : > { %4028 = vmatprep.subr.bf16.mxu0 %v4655_v10  ;;  %v4680_v9 = vld [vmem:[%s5709_s2 + $0x100] sm:$0xff]   ;;  %v771_v12 = vpack.c.bf16 %v3382_v8, %v3381_v7  ;;  %v3417_v42 = vld [vmem:[%s4884_s16 + $0x210] sm:$0xff]  ;;  %v4697_v8 = vld [vmem:[%s5709_s2 + $0x188] sm:$0xff]  }
  0x21   : > { %v3385_v15 = vld [vmem:[%s4884_s16 + $0x180] sm:$0xff]  ;;  %v4694_v63 = vld [vmem:[%s5709_s2 + $0x170] sm:$0xff]  }
  0x23   : > { %4029 = vmatpush3.bf16.msra.mxu0 %v4655_v10  ;;  %v3383_v10 = vld [vmem:[%s4884_s16 + $0x160] sm:$0xff] }
  0x24   : > { %4038 = vmatprep.subr.bf16.mxu0 %v4656_v11 }
  0x26   : > { %4031 = vmatmul.mubr.bf16.vlgmr.msra.gmra.mrb[0].mxu0 %v365_v16  ;;  %v3386_v16 = vld [vmem:[%s4884_s16 + $0x190] sm:$0xff] }
  0x27   : > { %4039 = vmatpush3.bf16.msra.mxu0 %v4656_v11  ;;  %4034 = vmatprep.mubr.bf16.mxu0 %v366_v17  ;;  %v3384_v11 = vld [vmem:[%s4884_s16 + $0x170] sm:$0xff]  ;;  %v773_v20 = vpack.c.bf16 %v3386_v16, %v3385_v15  ;;  %v4700_v15 = vld [vmem:[%s5709_s2 + $0x1a0] sm:$0xff]   ;;  %v4701_v16 = vld [vmem:[%s5709_s2 + $0x1a8] sm:$0xff]  }
  0x28   : > { %4040 = vmatprep.subr.bf16.mxu0 %v4657_v18  ;;  %v772_v14 = vpack.c.bf16 %v3384_v11, %v3383_v10  ;;  %v4682_v17 = vld [vmem:[%s5709_s2 + $0x110] sm:$0xff]  }
  0x29   : > { %v3450_v10 = vld [vmem:[%s4884_s16 + $0x191] sm:$0xff] }
  0x2a   : > { %v4698_v11 = vld [vmem:[%s5709_s2 + $0x190] sm:$0xff]  }
  0x2b   : > { %4041 = vmatpush3.bf16.msra.mxu0 %v4657_v18  ;;  %v3411_v18 = vld [vmem:[%s4884_s16 + $0x1b0] sm:$0xff] }
  0x2c   : > { %4042 = vmatprep.subr.bf16.mxu0 %v4658_v19 }
  0x2e   : > { %4035 = vmatmul.mubr.bf16.gmra.mrb[4].mxu0 %v367_v24  ;;  %v4684_v24 = vld [vmem:[%s5709_s2 + $0x120] sm:$0xff]  }
  0x2f   : > { %4043 = vmatpush3.bf16.msra.mxu0 %v4658_v19  ;;  %4054 = vmatprep.mubr.bf16.mxu0 %v335_v25  ;;  %v3412_v19 = vld [vmem:[%s4884_s16 + $0x1c0] sm:$0xff]  ;;  %v4685_v25 = vld [vmem:[%s5709_s2 + $0x128] sm:$0xff]  }
  0x30   : > { %4044 = vmatprep.subr.bf16.mxu0 %v4659_v26  ;;  %v921_v22 = vpack.c.bf16 %v3412_v19, %v3411_v18  ;;  %v1223_v18 = vpack.c.bf16 %v4948_v34, %v4945_v33  ;;  %v1224_v19 = vpack.c.bf16 %v4961_v39, %v4951_v35  ;;  %v4800_v34 = vld [vmem:[%s4884_s16 + $0xa0] sm:$0xff]  ;;  %v4707_v39 = vld [vmem:[%s5709_s2 + $0x1d8] sm:$0xff]  }
  0x33   : > { %4045 = vmatpush3.bf16.msra.mxu0 %v4659_v26  ;;  %v4686_v26 = vld [vmem:[%s5709_s2 + $0x130] sm:$0xff]  }
  0x34   : > { %4046 = vmatprep.subr.bf16.mxu0 %v4660_v27 }
  0x37   : > { %4047 = vmatpush3.bf16.msra.mxu0 %v4660_v27  ;;  %v4687_v27 = vld [vmem:[%s5709_s2 + $0x138] sm:$0xff]  }
  0x38   : > { %4048 = vmatprep.subr.bf16.mxu0 %v4661_v28 }
  0x3b   : > { %4049 = vmatpush3.bf16.msra.mxu0 %v4661_v28  ;;  %v3413_v28 = vld [vmem:[%s4884_s16 + $0x1d0] sm:$0xff] }
  0x3c   : > { %4050 = vmatprep.subr.bf16.mxu0 %v4662_v29 }
  0x3f   : > { %4051 = vmatpush3.bf16.msra.mxu0 %v4662_v29  ;;  %v3414_v29 = vld [vmem:[%s4884_s16 + $0x1e0] sm:$0xff] }
  0x40   : > { %4052 = vmatprep.subr.bf16.mxu0 %v4663_v30 }
  0x43   : > { %4053 = vmatpush3.bf16.msra.mxu0 %v4663_v30  ;;  %v4688_v30 = vld [vmem:[%s5709_s2 + $0x140] sm:$0xff]  }
  0x44   : > { %4062 = vmatprep.subr.bf16.mxu0 %v4664_v31 }
  0x46   : > { %4055 = vmatmul.mubr.bf16.vlgmr.msra.gmra.mrb[0].mxu0 %v336_v36  ;;  %v3416_v36 = vld [vmem:[%s4884_s16 + $0x200] sm:$0xff] }
  0x47   : > { %4063 = vmatpush3.bf16.msra.mxu0 %v4664_v31  ;;  %4058 = vmatprep.mubr.bf16.mxu0 %v337_v37  ;;  %v3415_v31 = vld [vmem:[%s4884_s16 + $0x1f0] sm:$0xff]  ;;  %v922_v37 = vpack.c.bf16 %v3414_v29, %v3413_v28  ;;  %v4712_v28 = vld [vmem:[%s5709_s2 + $0x200] sm:$0xff]  }
  0x48   : > { %4064 = vmatprep.subr.bf16.mxu0 %v4665_v38  ;;  %v4802_v29 = vld [vmem:[%s4884_s16 + $0xc0] sm:$0xff] }
  0x4b   : > { %4065 = vmatpush3.bf16.msra.mxu0 %v4665_v38  ;;  %v923_v38 = vpack.c.bf16 %v3416_v36, %v3415_v31  ;;  %v4804_v36 = vld [vmem:[%s4884_s16 + $0xe0] sm:$0xff] }
  0x4c   : > { %4066 = vmatprep.subr.bf16.mxu0 %v4666_v41 }
  0x4e   : > { %4059 = vmatmul.mubr.bf16.gmra.mrb[4].mxu0 %v338_v44  ;;  %v3418_v44 = vld [vmem:[%s4884_s16 + $0x220] sm:$0xff] }
  0x4f   : > { %4067 = vmatpush3.bf16.msra.mxu0 %v4666_v41  ;;  %4078 = vmatprep.mubr.bf16.mxu0 %v619_v46  ;;  %v4689_v41 = vld [vmem:[%s5709_s2 + $0x148] sm:$0xff]  }
  0x50   : > { %4068 = vmatprep.subr.bf16.mxu0 %v4667_v45  ;;  %v3443_v46 = vld [vmem:[%s4884_s16 + $0x121] sm:$0xff] }
  0x53   : > { %4069 = vmatpush3.bf16.msra.mxu0 %v4667_v45  ;;  %v4690_v45 = vld [vmem:[%s5709_s2 + $0x150] sm:$0xff]  }
  0x54   : > { %4070 = vmatprep.subr.bf16.mxu0 %v4668_v47 }
  0x57   : > { %4071 = vmatpush3.bf16.msra.mxu0 %v4668_v47  ;;  %v3444_v47 = vld [vmem:[%s4884_s16 + $0x131] sm:$0xff] }
  0x58   : > { %4072 = vmatprep.subr.bf16.mxu0 %v4669_v48 }
  0x5b   : > { %4073 = vmatpush3.bf16.msra.mxu0 %v4669_v48  ;;  %v924_v48 = vpack.c.bf16 %v3418_v44, %v3417_v42  ;;  %v3514_v42 = vld [vmem:[%s4884_s16 + $0x110] sm:$0xff] }
  0x5c   : > { %4074 = vmatprep.subr.bf16.mxu0 %v4670_v49  ;;  %v4714_v44 = vld [vmem:[%s5709_s2 + $0x210] sm:$0xff]  }
  0x5f   : > { %4075 = vmatpush3.bf16.msra.mxu0 %v4670_v49  ;;  %v1071_v49 = vpack.c.bf16 %v3444_v47, %v3443_v46  ;;  %v1523_v47 = vpack.c.bf16 %v4992_v51, %v4971_v43  ;;  %v4717_v43 = vld [vmem:[%s5709_s2 + $0x228] sm:$0xff]   ;;  %v4718_v51 = vld [vmem:[%s5709_s2 + $0x230] sm:$0xff]  }
  0x60   : > { %4076 = vmatprep.subr.bf16.mxu0 %v4671_v50 }
  0x63   : > { %4077 = vmatpush3.bf16.msra.mxu0 %v4671_v50  ;;  %v4691_v50 = vld [vmem:[%s5709_s2 + $0x158] sm:$0xff]  }
  0x64   : > { %4086 = vmatprep.subr.bf16.mxu0 %v4672_v53 }
  0x66   : > { %4079 = vmatmul.mubr.bf16.vlgmr.msra.gmra.mrb[0].mxu0 %v620_v56  ;;  %v4721_v56 = vld [vmem:[%s5711_s4 + $0x48] sm:$0xff]  }
  0x67   : > { %4087 = vmatpush3.bf16.msra.mxu0 %v4672_v53  ;;  %4082 = vmatprep.mubr.bf16.mxu0 %v621_v58  ;;  %v4720_v53 = vld [vmem:[%s5711_s4 + $0x40] sm:$0xff]   ;;  %v4722_v58 = vld [vmem:[%s5711_s4 + $0x50] sm:$0xff]  }
  0x68   : > { %4088 = vmatprep.subr.bf16.mxu0 %v4673_v57  ;;  %4230 = vmatprep.subr.bf16.mxu1 %v4720_v53 }
  0x69   : > { %4231 = vmatpush3.bf16.msra.mxu1 %v4720_v53  ;;  %v1524_v53 = vpack.c.bf16 %v5001_v54, %v4995_v52  ;;  %v4725_v52 = vld [vmem:[%s5711_s4 + $0x68] sm:$0xff]   ;;  %v4815_v54 = vmov 0.0  }
  0x6a   : > { %4232 = vmatprep.subr.bf16.mxu1 %v4721_v56  ;;  %1694 = vst [vmem:[#allocation2 + $0x30] sm:$0xff] %v4815_v54  ;;  %1695 = vst [vmem:[#allocation2 + $0x38] sm:$0x3] %v4815_v54 }
  0x6b   : > { %4089 = vmatpush3.bf16.msra.mxu0 %v4673_v57  ;;  %v4692_v57 = vld [vmem:[%s5709_s2 + $0x160] sm:$0xff]   ;;  %1688 = vst [vmem:[#allocation2] sm:$0xff] %v4815_v54  ;;  %1689 = vst [vmem:[#allocation2 + $0x8] sm:$0x3] %v4815_v54 }
  0x6c   : > { %4090 = vmatprep.subr.bf16.mxu0 %v4674_v61  ;;  %1690 = vst [vmem:[#allocation2 + $0x10] sm:$0xff] %v4815_v54  ;;  %1691 = vst [vmem:[#allocation2 + $0x18] sm:$0x3] %v4815_v54 }
  0x6d   : > { %4233 = vmatpush3.bf16.msra.mxu1 %v4721_v56  ;;  %v1525_v56 = vpack.c.bf16 %v5014_v59, %v5004_v55  ;;  %1692 = vst [vmem:[#allocation2 + $0x20] sm:$0xff] %v4815_v54  ;;  %1693 = vst [vmem:[#allocation2 + $0x28] sm:$0x3] %v4815_v54  ;;  %v4726_v55 = vld [vmem:[%s5711_s4 + $0x70] sm:$0xff]   ;;  %v4727_v59 = vld [vmem:[%s5711_s4 + $0x78] sm:$0xff]  }
  0x6e   : > { %4083 = vmatmul.mubr.bf16.gmra.mrb[4].mxu0 %v622_v0  ;;  %4234 = vmatprep.subr.bf16.mxu1 %v4722_v58  ;;  %v4695_v0 = vld [vmem:[%s5709_s2 + $0x178] sm:$0xff]   ;;  %1696 = vst [vmem:[#allocation2 + $0x40] sm:$0xff] %v4815_v54  ;;  %1697 = vst [vmem:[#allocation2 + $0x48] sm:$0x3] %v4815_v54 }
  0x6f   : > { %4091 = vmatpush3.bf16.msra.mxu0 %v4674_v61  ;;  %4102 = vmatprep.mubr.bf16.mxu0 %v770_v2  ;;  %v4693_v61 = vld [vmem:[%s5709_s2 + $0x168] sm:$0xff]   ;;  %v3446_v2 = vld [vmem:[%s4884_s16 + $0x151] sm:$0xff]  ;;  %1698 = vst [vmem:[#allocation2 + $0x50] sm:$0xff] %v4815_v54  ;;  %1699 = vst [vmem:[#allocation2 + $0x58] sm:$0x3] %v4815_v54 }
  0x70   : > { %4092 = vmatprep.subr.bf16.mxu0 %v4675_v1  ;;  %1700 = vst [vmem:[#allocation2 + $0x60] sm:$0xff] %v4815_v54  ;;  %1701 = vst [vmem:[#allocation2 + $0x68] sm:$0x3] %v4815_v54 }
  0x71   : > { %4235 = vmatpush3.bf16.msra.mxu1 %v4722_v58  ;;  %1702 = vst [vmem:[#allocation2 + $0x70] sm:$0xff] %v4815_v54  ;;  %1703 = vst [vmem:[#allocation2 + $0x78] sm:$0x3] %v4815_v54 }
  0x72   : > { %4236 = vmatprep.subr.bf16.mxu1 %v4723_v62  ;;  %1704 = vst [vmem:[#allocation2 + $0x80] sm:$0xff] %v4815_v54  ;;  %1705 = vst [vmem:[#allocation2 + $0x88] sm:$0x3] %v4815_v54 }
  0x73   : > { %4093 = vmatpush3.bf16.msra.mxu0 %v4675_v1  ;;  %v3445_v1 = vld [vmem:[%s4884_s16 + $0x141] sm:$0xff]  ;;  %1706 = vst [vmem:[#allocation2 + $0x90] sm:$0xff] %v4815_v54  ;;  %1707 = vst [vmem:[#allocation2 + $0x98] sm:$0x3] %v4815_v54 }
  0x74   : > { %4094 = vmatprep.subr.bf16.mxu0 %v4676_v3 }
  0x75   : > { %4237 = vmatpush3.bf16.msra.mxu1 %v4723_v62  ;;  %v3571_v62 = vld [vmem:[%s5710_s3] ss:$0 sm:$0xff] }
  0x77   : > { %4095 = vmatpush3.bf16.msra.mxu0 %v4676_v3  ;;  %v4696_v3 = vld [vmem:[%s5709_s2 + $0x180] sm:$0xff]  }
  0x78   : > { %4096 = vmatprep.subr.bf16.mxu0 %v4677_v4 }
  0x7b   : > { %4097 = vmatpush3.bf16.msra.mxu0 %v4677_v4  ;;  %v3447_v4 = vld [vmem:[%s4884_s16 + $0x161] sm:$0xff] }
  0x7c   : > { %4098 = vmatprep.subr.bf16.mxu0 %v4678_v5 }
  0x7f   : > { %4099 = vmatpush3.bf16.msra.mxu0 %v4678_v5  ;;  %v3448_v5 = vld [vmem:[%s4884_s16 + $0x171] sm:$0xff] }
  0x80   : > { %4100 = vmatprep.subr.bf16.mxu0 %v4679_v6  ;;  %v1073_v7 = vpack.c.bf16 %v3448_v5, %v3447_v4 }
  0x83   : > { %4101 = vmatpush3.bf16.msra.mxu0 %v4679_v6  ;;  %v1072_v6 = vpack.c.bf16 %v3446_v2, %v3445_v1 }
  0x84   : > { %4110 = vmatprep.subr.bf16.mxu0 %v4680_v9 }
  0x86   : > { %4103 = vmatmul.mubr.bf16.vlgmr.msra.gmra.mrb[0].mxu0 %v771_v12 }
  0x87   : > { %4111 = vmatpush3.bf16.msra.mxu0 %v4680_v9  ;;  %4106 = vmatprep.mubr.bf16.mxu0 %v772_v14  ;;  %v3449_v9 = vld [vmem:[%s4884_s16 + $0x181] sm:$0xff]  ;;  %v4699_v14 = vld [vmem:[%s5709_s2 + $0x198] sm:$0xff]  }
  0x88   : > { %4112 = vmatprep.subr.bf16.mxu0 %v4681_v13  ;;  %v1074_v12 = vpack.c.bf16 %v3450_v10, %v3449_v9 }
  0x8b   : > { %4113 = vmatpush3.bf16.msra.mxu0 %v4681_v13  ;;  %v1222_v13 = vpack.c.bf16 %v4942_v32, %v4920_v23  ;;  %v4702_v23 = vld [vmem:[%s5709_s2 + $0x1b0] sm:$0xff]   ;;  %v4703_v32 = vld [vmem:[%s5709_s2 + $0x1b8] sm:$0xff]  }
  0x8c   : > { %4114 = vmatprep.subr.bf16.mxu0 %v4682_v17 }
  0x8e   : > { %4107 = vmatmul.mubr.bf16.gmra.mrb[4].mxu0 %v773_v20  ;;  %v4705_v20 = vld [vmem:[%s5709_s2 + $0x1c8] sm:$0xff]  }
  0x8f   : > { %4115 = vmatpush3.bf16.msra.mxu0 %v4682_v17  ;;  %4126 = vmatprep.mubr.bf16.mxu0 %v921_v22  ;;  %v4704_v17 = vld [vmem:[%s5709_s2 + $0x1c0] sm:$0xff]   ;;  %v4706_v22 = vld [vmem:[%s5709_s2 + $0x1d0] sm:$0xff]  }
  0x90   : > { %4116 = vmatprep.subr.bf16.mxu0 %v4683_v21 }
  0x93   : > { %4117 = vmatpush3.bf16.msra.mxu0 %v4683_v21  ;;  %v3482_v21 = vld [vmem:[%s4884_s16 + $0x80] sm:$0xff] }
  0x94   : > { %4118 = vmatprep.subr.bf16.mxu0 %v4684_v24  ;;  %v1225_v33 = vpack.c.bf16 %v3482_v21, %v4964_v40  ;;  %v4709_v40 = vld [vmem:[%s5709_s2 + $0x1e8] sm:$0xff]  }
  0x97   : > { %4119 = vmatpush3.bf16.msra.mxu0 %v4684_v24  ;;  %v4801_v24 = vld [vmem:[%s4884_s16 + $0xb0] sm:$0xff] }
  0x98   : > { %4120 = vmatprep.subr.bf16.mxu0 %v4685_v25  ;;  %v1373_v35 = vpack.c.bf16 %v4801_v24, %v4800_v34  ;;  %v4730_v24 = vld [vmem:[%s5711_s4 + $0x10] sm:$0xff]  }
  0x9b   : > { %4121 = vmatpush3.bf16.msra.mxu0 %v4685_v25  ;;  %v4708_v25 = vld [vmem:[%s5709_s2 + $0x1e0] sm:$0xff]  }
  0x9c   : > { %4122 = vmatprep.subr.bf16.mxu0 %v4686_v26 }
  0x9f   : > { %4123 = vmatpush3.bf16.msra.mxu0 %v4686_v26  ;;  %v4710_v26 = vld [vmem:[%s5709_s2 + $0x1f0] sm:$0xff]  }
  0xa0   : > { %4124 = vmatprep.subr.bf16.mxu0 %v4687_v27 }
  0xa3   : > { %4125 = vmatpush3.bf16.msra.mxu0 %v4687_v27  ;;  %v4711_v27 = vld [vmem:[%s5709_s2 + $0x1f8] sm:$0xff]  }
  0xa4   : > { %4134 = vmatprep.subr.bf16.mxu0 %v4688_v30 }
  0xa6   : > { %4127 = vmatmul.mubr.bf16.vlgmr.msra.gmra.mrb[0].mxu0 %v922_v37  ;;  %v4805_v37 = vld [vmem:[%s4884_s16 + $0xf0] sm:$0xff] }
  0xa7   : > { %4135 = vmatpush3.bf16.msra.mxu0 %v4688_v30  ;;  %4130 = vmatprep.mubr.bf16.mxu0 %v923_v38  ;;  %v4803_v30 = vld [vmem:[%s4884_s16 + $0xd0] sm:$0xff]  ;;  %v1375_v38 = vpack.c.bf16 %v4805_v37, %v4804_v36  ;;  %v4731_v36 = vld [vmem:[%s5711_s4 + $0x18] sm:$0xff]  }
  0xa8   : > { %4136 = vmatprep.subr.bf16.mxu0 %v4689_v41  ;;  %v1374_v31 = vpack.c.bf16 %v4803_v30, %v4802_v29 }
  0xab   : > { %4137 = vmatpush3.bf16.msra.mxu0 %v4689_v41  ;;  %v4713_v41 = vld [vmem:[%s5709_s2 + $0x208] sm:$0xff]  }
  0xac   : > { %4138 = vmatprep.subr.bf16.mxu0 %v4690_v45 }
  0xae   : > { %4131 = vmatmul.mubr.bf16.gmra.mrb[4].mxu0 %v924_v48  ;;  %v4715_v48 = vld [vmem:[%s5709_s2 + $0x218] sm:$0xff]  }
  0xaf   : > { %4139 = vmatpush3.bf16.msra.mxu0 %v4690_v45  ;;  %4150 = vmatprep.mubr.bf16.mxu0 %v1071_v49  ;;  %v4806_v45 = vld [vmem:[%s4884_s16 + $0x100] sm:$0xff] }
  0xb0   : > { %4140 = vmatprep.subr.bf16.mxu0 %v4691_v50  ;;  %v1376_v46 = vpack.c.bf16 %v3514_v42, %v4806_v45  ;;  %v4716_v49 = vld [vmem:[%s5709_s2 + $0x220] sm:$0xff]  }
  0xb3   : > { %4141 = vmatpush3.bf16.msra.mxu0 %v4691_v50  ;;  %v4719_v50 = vld [vmem:[%s5709_s2 + $0x238] sm:$0xff]  }
  0xb4   : > { %4142 = vmatprep.subr.bf16.mxu0 %v4692_v57 }
  0xb7   : > { %4143 = vmatpush3.bf16.msra.mxu0 %v4692_v57  ;;  %v3546_v57 = vld [vmem:[%s4884_s16 + $0x81] sm:$0xff] }
  0xb8   : > { %4144 = vmatprep.subr.bf16.mxu0 %v4693_v61  ;;  %v1526_v58 = vpack.c.bf16 %v3546_v57, %v5017_v60  ;;  %v4728_v60 = vld [vmem:[%s5711_s4] sm:$0xff]  }
  0xbb   : > { %4145 = vmatpush3.bf16.msra.mxu0 %v4693_v61  ;;  %v4724_v61 = vld [vmem:[%s5711_s4 + $0x60] sm:$0xff]  }
  0xbc   : > { %4146 = vmatprep.subr.bf16.mxu0 %v4694_v63  ;;  %4238 = vmatprep.subr.bf16.mxu1 %v4724_v61 }
  0xbd   : > { %4239 = vmatpush3.bf16.msra.mxu1 %v4724_v61  ;;  %v4737_v61 = vld [vmem:[%s5711_s4 + $0x88] sm:$0xff]  }
  0xbe   : > { %4240 = vmatprep.subr.bf16.mxu1 %v4725_v52 }
  0xbf   : > { %4147 = vmatpush3.bf16.msra.mxu0 %v4694_v63 }
  0xc0   : > { %4148 = vmatprep.subr.bf16.mxu0 %v4695_v0 }
  0xc1   : > { %4241 = vmatpush3.bf16.msra.mxu1 %v4725_v52 }
  0xc2   : > { %4242 = vmatprep.subr.bf16.mxu1 %v4726_v55 }
  0xc3   : > { %4149 = vmatpush3.bf16.msra.mxu0 %v4695_v0 }
  0xc4   : > { %4158 = vmatprep.subr.bf16.mxu0 %v4696_v3 }
  0xc5   : > { %4243 = vmatpush3.bf16.msra.mxu1 %v4726_v55  ;;  %v4738_v55 = vld [vmem:[%s5711_s4 + $0x90] sm:$0xff]  }
  0xc6   : > { %4151 = vmatmul.mubr.bf16.vlgmr.msra.gmra.mrb[0].mxu0 %v1072_v6  ;;  %4244 = vmatprep.subr.bf16.mxu1 %v4727_v59 }
  0xc7   : > { %4159 = vmatpush3.bf16.msra.mxu0 %v4696_v3  ;;  %4154 = vmatprep.mubr.bf16.mxu0 %v1073_v7  ;;  %v1745_v7 = vld [vmem:[#allocation2 + $0x1] sm:$0xff] }
  0xc8   : > { %4160 = vmatprep.subr.bf16.mxu0 %v4697_v8 }
  0xc9   : > { %4245 = vmatpush3.bf16.msra.mxu1 %v4727_v59 }
  0xca   : > { %4254 = vmatprep.subr.bf16.mxu1 %v4728_v60 }
  0xcb   : > { %4161 = vmatpush3.bf16.msra.mxu0 %v4697_v8 }
  0xcc   : > { %4162 = vmatprep.subr.bf16.mxu0 %v4698_v11 }
  0xce   : > { %4155 = vmatmul.mubr.bf16.gmra.mrb[4].mxu0 %v1074_v12 }
  0xcf   : > { %4163 = vmatpush3.bf16.msra.mxu0 %v4698_v11  ;;  %4174 = vmatprep.mubr.bf16.mxu0 %v1222_v13 }
  0xd0   : > { %4164 = vmatprep.subr.bf16.mxu0 %v4699_v14 }
  0xd3   : > { %4165 = vmatpush3.bf16.msra.mxu0 %v4699_v14 }
  0xd4   : > { %4166 = vmatprep.subr.bf16.mxu0 %v4700_v15 }
  0xd7   : > { %4167 = vmatpush3.bf16.msra.mxu0 %v4700_v15 }
  0xd8   : > { %4168 = vmatprep.subr.bf16.mxu0 %v4701_v16 }
  0xdb   : > { %4169 = vmatpush3.bf16.msra.mxu0 %v4701_v16  ;;  %v4729_v16 = vld [vmem:[%s5711_s4 + $0x8] sm:$0xff]  }
  0xdc   : > { %4170 = vmatprep.subr.bf16.mxu0 %v4702_v23 }
  0xdf   : > { %4171 = vmatpush3.bf16.msra.mxu0 %v4702_v23 }
  0xe0   : > { %4172 = vmatprep.subr.bf16.mxu0 %v4703_v32 }
  0xe3   : > { %4173 = vmatpush3.bf16.msra.mxu0 %v4703_v32 }
  0xe4   : > { %4182 = vmatprep.subr.bf16.mxu0 %v4704_v17 }
  0xe6   : > { %4175 = vmatmul.mubr.bf16.vlgmr.msra.gmra.mrb[0].mxu0 %v1223_v18 }
  0xe7   : > { %4183 = vmatpush3.bf16.msra.mxu0 %v4704_v17  ;;  %4178 = vmatprep.mubr.bf16.mxu0 %v1224_v19 }
  0xe8   : > { %4184 = vmatprep.subr.bf16.mxu0 %v4705_v20 }
  0xeb   : > { %4185 = vmatpush3.bf16.msra.mxu0 %v4705_v20 }
  0xec   : > { %4186 = vmatprep.subr.bf16.mxu0 %v4706_v22 }
  0xee   : > { %4179 = vmatmul.mubr.bf16.gmra.mrb[4].mxu0 %v1225_v33 }
  0xef   : > { %4187 = vmatpush3.bf16.msra.mxu0 %v4706_v22  ;;  %4198 = vmatprep.mubr.bf16.mxu0 %v1373_v35 }
  0xf0   : > { %4188 = vmatprep.subr.bf16.mxu0 %v4707_v39 }
  0xf3   : > { %4189 = vmatpush3.bf16.msra.mxu0 %v4707_v39 }
  0xf4   : > { %4190 = vmatprep.subr.bf16.mxu0 %v4708_v25 }
  0xf7   : > { %4191 = vmatpush3.bf16.msra.mxu0 %v4708_v25 }
  0xf8   : > { %4192 = vmatprep.subr.bf16.mxu0 %v4709_v40 }
  0xfb   : > { %4193 = vmatpush3.bf16.msra.mxu0 %v4709_v40 }
  0xfc   : > { %4194 = vmatprep.subr.bf16.mxu0 %v4710_v26 }
  0xff   : > { %4195 = vmatpush3.bf16.msra.mxu0 %v4710_v26 }
 0x100   : > { %4196 = vmatprep.subr.bf16.mxu0 %v4711_v27 }
 0x103   : > { %4197 = vmatpush3.bf16.msra.mxu0 %v4711_v27 }
 0x104   : > { %4206 = vmatprep.subr.bf16.mxu0 %v4712_v28 }
 0x106   : > { %4199 = vmatmul.mubr.bf16.vlgmr.msra.gmra.mrb[0].mxu0 %v1374_v31 }
 0x107   : > { %4207 = vmatpush3.bf16.msra.mxu0 %v4712_v28  ;;  %4202 = vmatprep.mubr.bf16.mxu0 %v1375_v38 }
 0x108   : > { %4208 = vmatprep.subr.bf16.mxu0 %v4713_v41 }
 0x10b   : > { %4209 = vmatpush3.bf16.msra.mxu0 %v4713_v41 }
 0x10c   : > { %4210 = vmatprep.subr.bf16.mxu0 %v4714_v44 }
 0x10e   : > { %4203 = vmatmul.mubr.bf16.gmra.mrb[4].mxu0 %v1376_v46 }
 0x10f   : > { %4211 = vmatpush3.bf16.msra.mxu0 %v4714_v44  ;;  %4222 = vmatprep.mubr.bf16.mxu0 %v1523_v47  ;;  %v4732_v44 = vld [vmem:[%s5711_s4 + $0x20] sm:$0xff]   ;;  %v4733_v47 = vld [vmem:[%s5711_s4 + $0x28] sm:$0xff]  }
 0x110   : > { %4212 = vmatprep.subr.bf16.mxu0 %v4715_v48 }
 0x113   : > { %4213 = vmatpush3.bf16.msra.mxu0 %v4715_v48 }
 0x114   : > { %4214 = vmatprep.subr.bf16.mxu0 %v4716_v49 }
 0x117   : > { %4215 = vmatpush3.bf16.msra.mxu0 %v4716_v49  ;;  %v4734_v49 = vld [vmem:[%s5711_s4 + $0x30] sm:$0xff]  }
 0x118   : > { %4216 = vmatprep.subr.bf16.mxu0 %v4717_v43 }
 0x11b   : > { %4217 = vmatpush3.bf16.msra.mxu0 %v4717_v43  ;;  %v4735_v43 = vld [vmem:[%s5711_s4 + $0x38] sm:$0xff]  }
 0x11c   : > { %4218 = vmatprep.subr.bf16.mxu0 %v4718_v51 }
 0x11f   : > { %4219 = vmatpush3.bf16.msra.mxu0 %v4718_v51  ;;  %v4736_v51 = vld [vmem:[%s5711_s4 + $0x80] sm:$0xff]  }
 0x120   : > { %4220 = vmatprep.subr.bf16.mxu0 %v4719_v50 }
 0x123   : > { %4221 = vmatpush3.bf16.msra.mxu0 %v4719_v50 }
 0x126   : > { %4223 = vmatmul.mubr.bf16.vlgmr.msra.gmra.mrb[0].mxu0 %v1524_v53 }
 0x127   : > { %4226 = vmatprep.mubr.bf16.mxu0 %v1525_v56 }
 0x12e   : > { %4227 = vmatmul.mubr.bf16.gmra.mrb[4].mxu0 %v1526_v58 }
 0x1f9   : > { %v4224_v63 = vpop.f32.mrb[0].mxu0 }
 0x1fa   : > { %v1674_v0 = vadd.f32 %v4224_v63, %v3571_v62  ;;  %v1626_v1 = vpop.f32.mrb[1].mxu0 }
 0x1fb   : > { %v1672_v2 = vadd.f32 %v3571_v62, %v1626_v1  ;;  %v4225_v3 = vpop.f32.mrb[2].mxu0 }
 0x1fc   : > { %v5257_v4 = vmax.f32 %v1674_v0, 0.0  ;;  %v1675_v5 = vadd.f32 %v4225_v3, %v3571_v62  ;;  %v1629_v6 = vpop.f32.mrb[3].mxu0  ;;  %v4739_v0 = vld [vmem:[%s5711_s4 + $0x98] sm:$0xff]   ;;  %v4741_v3 = vld [vmem:[%s5711_s4 + $0xa8] sm:$0xff]  }
 0x1fd   : > { %v5259_v8 = vmax.f32 %v1672_v2, 0.0  ;;  %v1673_v9 = vadd.f32 %v3571_v62, %v1629_v6  ;;  %v4740_v2 = vld [vmem:[%s5711_s4 + $0xa0] sm:$0xff]   ;;  %v4743_v6 = vld [vmem:[%s5711_s4 + $0xb8] sm:$0xff]  }
 0x1fe   : > { %1711 = vst [vmem:[#allocation2 + $0x31] sm:$0xff] %v5257_v4  ;;  %v5262_v10 = vmax.f32 %v1675_v5, 0.0  ;;  %v4742_v5 = vld [vmem:[%s5711_s4 + $0xb0] sm:$0xff]  }
 0x1ff   : > { %1709 = vst [vmem:[#allocation2 + $0x11] sm:$0xff] %v5259_v8  ;;  %v5265_v11 = vmax.f32 %v1673_v9, 0.0  ;;  %v1753_v12 = vpack.c.bf16 %v5259_v8, %v1745_v7  ;;  %v4744_v7 = vld [vmem:[%s5711_s4 + $0xc0] sm:$0xff]  }
 0x200   : > { %1712 = vst [vmem:[#allocation2 + $0x41] sm:$0xff] %v5262_v10  ;;  %v2309_v13 = vpack.c.bf16 %v5262_v10, %v5257_v4 }
 0x201   : > { %1710 = vst [vmem:[#allocation2 + $0x21] sm:$0xff] %v5265_v11  ;;  %v4228_v14 = vpop.f32.mrb[4].mxu0  ;;  %4246 = vmatprep.mubr.bf16.mxu1 %v1753_v12  ;;  %v5274_v15 = vpack.c.bf16 %v5257_v4, %v5265_v11  ;;  %v2308_v23 = vpack.c.bf16 %v5265_v11, %v5259_v8  ;;  %v4745_v12 = vld [vmem:[%s5711_s4 + $0xc8] sm:$0xff]   ;;  %v5499_v11 = vld [vmem:[%s5713_s6 + $0x20] sm:$0xff]   ;;  %v4763_v4 = vld [vmem:[%s5711_s4 + $0x158] sm:$0xff]  }
 0x202   : > { %v1678_v32 = vadd.f32 %v4228_v14, %v3571_v62  ;;  %v1642_v17 = vpop.f32.mrb[5].mxu0  ;;  %v4757_v8 = vld [vmem:[%s5711_s4 + $0x128] sm:$0xff]  }
 0x203   : > { %v1676_v18 = vadd.f32 %v3571_v62, %v1642_v17  ;;  %v4229_v19 = vpop.f32.mrb[6].mxu0  ;;  %4247 = vmatmul.mubr.bf16.vlgmr.msra.gmra.mrb[0].mxu1 %v5274_v15 }
 0x204   : > { %v5282_v20 = vmax.f32 %v1678_v32, 0.0  ;;  %v1679_v21 = vadd.f32 %v4229_v19, %v3571_v62  ;;  %v1645_v22 = vpop.f32.mrb[7].mxu0  ;;  %4255 = vmatpush3.bf16.msra.mxu1 %v4728_v60  ;;  %v2000_v60 = vld [vmem:[#allocation2 + $0x2] sm:$0xff] }
 0x205   : > { %v5284_v33 = vmax.f32 %v1676_v18, 0.0  ;;  %v1677_v34 = vadd.f32 %v3571_v62, %v1645_v22  ;;  %4256 = vmatprep.subr.bf16.mxu1 %v4729_v16  ;;  %v5301_v26 = vld [vmem:[#allocation2 + $0x32] sm:$0xff]  ;;  %v4749_v22 = vld [vmem:[%s5711_s4 + $0xe8] sm:$0xff]  }
 0x206   : > { %1715 = vst [vmem:[#allocation2 + $0x71] sm:$0xff] %v5282_v20  ;;  %v5290_v35 = vmax.f32 %v1679_v21, 0.0  ;;  %v5299_v40 = vld [vmem:[#allocation2 + $0x10] sm:$0xff]  ;;  %v4747_v18 = vld [vmem:[%s5711_s4 + $0xd8] sm:$0xff]   ;;  %v4748_v21 = vld [vmem:[%s5711_s4 + $0xe0] sm:$0xff]  }
 0x207   : > { %1713 = vst [vmem:[#allocation2 + $0x51] sm:$0xff] %v5284_v33  ;;  %v5293_v39 = vmax.f32 %v1677_v34, 0.0  ;;  %v5297_v25 = vpack.c.bf16 %v5284_v33, %v5262_v10  ;;  %v5303_v27 = vld [vmem:[#allocation2 + $0x42] sm:$0xff]  ;;  %v5321_v37 = vld [vmem:[#allocation2 + $0x12] sm:$0xff]  ;;  %v1725_v38 = vpack.c.bf16 %v5299_v40, %v4815_v54 }
 0x208   : > { %1716 = vst [vmem:[#allocation2 + $0x81] sm:$0xff] %v5290_v35  ;;  %4257 = vmatpush3.bf16.msra.mxu1 %v4729_v16  ;;  %v5306_v28 = vld [vmem:[#allocation2 + $0x22] sm:$0xff]  ;;  %v2311_v29 = vpack.c.bf16 %v5290_v35, %v5282_v20  ;;  %v2459_v30 = vpack.c.bf16 %v5303_v27, %v5301_v26  ;;  %v5353_v56 = vld [vmem:[#allocation2 + $0x30] sm:$0xff]  ;;  %v2008_v1 = vpack.c.bf16 %v5321_v37, %v2000_v60 }
 0x209   : > { %1714 = vst [vmem:[#allocation2 + $0x61] sm:$0xff] %v5293_v39  ;;  %4250 = vmatprep.mubr.bf16.mxu1 %v5297_v25  ;;  %4258 = vmatprep.subr.bf16.mxu1 %v4730_v24  ;;  %v5316_v31 = vpack.c.bf16 %v5282_v20, %v5293_v39  ;;  %v2310_v41 = vpack.c.bf16 %v5293_v39, %v5284_v33  ;;  %v1719_v50 = vld [vmem:[#allocation2 + $0x20] sm:$0xff]  ;;  %v4746_v16 = vld [vmem:[%s5711_s4 + $0xd0] sm:$0xff]   ;;  %v4767_v33 = vld [vmem:[%s5711_s4 + $0x178] sm:$0xff]  }
 0x20a   : > { %v2458_v42 = vpack.c.bf16 %v5306_v28, %v5321_v37  ;;  %v5356_v57 = vpack.c.bf16 %v5353_v56, %v1719_v50  ;;  %v5358_v58 = vld [vmem:[#allocation2 + $0x40] sm:$0xff]  ;;  %v5402_v9 = vpack.c.bf16 %v5301_v26, %v5306_v28  ;;  %v2158_v19 = vpack.c.bf16 %v1719_v50, %v5299_v40  ;;  %v4750_v34 = vld [vmem:[%s5711_s4 + $0xf0] sm:$0xff]   ;;  %v4769_v28 = vld [vmem:[%s5711_s4 + $0x188] sm:$0xff]  }
 0x20b   : > { %4251 = vmatmul.mubr.bf16.gmra.mrb[4].mxu1 %v5316_v31  ;;  %v4752_v40 = vld [vmem:[%s5711_s4 + $0x100] sm:$0xff]   ;;  %v5519_v60 = vld [vmem:[%s5713_s6 + $0x30] sm:$0xff]   ;;  %v4771_v26 = vld [vmem:[%s5711_s4 + $0x198] sm:$0xff]  }
 0x20c   : > { %4259 = vmatpush3.bf16.msra.mxu1 %v4730_v24  ;;  %4270 = vmatprep.mubr.bf16.mxu1 %v1725_v38  ;;  %v4751_v24 = vld [vmem:[%s5711_s4 + $0xf8] sm:$0xff]   ;;  %v4753_v38 = vld [vmem:[%s5711_s4 + $0x108] sm:$0xff]   ;;  %v4764_v10 = vld [vmem:[%s5711_s4 + $0x160] sm:$0xff]  }
 0x20d   : > { %4260 = vmatprep.subr.bf16.mxu1 %v4731_v36  ;;  %v5374_v62 = vld [vmem:[#allocation2 + $0x70] sm:$0xff]  ;;  %v4768_v39 = vld [vmem:[%s5711_s4 + $0x180] sm:$0xff]  }
 0x20e   : > { %v5333_v45 = vld [vmem:[#allocation2 + $0x52] sm:$0xff] }
 0x20f   : > { %v5351_v53 = vld [vmem:[#allocation2 + $0x50] sm:$0xff]  ;;  %v5409_v14 = vpack.c.bf16 %v5333_v45, %v5303_v27  ;;  %v5593_v37 = vld [vmem:[#allocation2 + $0x82] sm:$0xff] }
 0x210   : > { %4261 = vmatpush3.bf16.msra.mxu1 %v4731_v36  ;;  %v5335_v46 = vld [vmem:[#allocation2 + $0x62] sm:$0xff]  ;;  %v5365_v52 = vpack.c.bf16 %v5351_v53, %v5358_v58  ;;  %v5416_v32 = vld [vmem:[#allocation2 + $0x72] sm:$0xff]  ;;  %v2159_v36 = vpack.c.bf16 %v5358_v58, %v5353_v56 }
 0x211   : > { %4262 = vmatprep.subr.bf16.mxu1 %v4732_v44  ;;  %v2460_v48 = vpack.c.bf16 %v5335_v46, %v5333_v45  ;;  %v5372_v59 = vld [vmem:[#allocation2 + $0x60] sm:$0xff]  ;;  %v5420_v17 = vpack.c.bf16 %v5416_v32, %v5335_v46  ;;  %v5476_v56 = vld [vmem:[%s5713_s6 + $0x10] sm:$0xff]   ;;  %v4775_v45 = vld [vmem:[%s5711_s4 + $0x1b8] sm:$0xff]  }
 0x212   : > { %v5378_v63 = vpack.c.bf16 %v5374_v62, %v5372_v59  ;;  %v4756_v58 = vld [vmem:[%s5711_s4 + $0x120] sm:$0xff]   ;;  %v4766_v20 = vld [vmem:[%s5711_s4 + $0x170] sm:$0xff]  }
 0x213   : > { %v4772_v27 = vld [vmem:[%s5711_s4 + $0x1a0] sm:$0xff]  }
 0x214   : > { %4263 = vmatpush3.bf16.msra.mxu1 %v4732_v44  ;;  %v2160_v44 = vpack.c.bf16 %v5372_v59, %v5351_v53  ;;  %v4755_v53 = vld [vmem:[%s5711_s4 + $0x118] sm:$0xff]   ;;  %v4776_v46 = vld [vmem:[%s5711_s4 + $0x1c0] sm:$0xff]  }
 0x215   : > { %4264 = vmatprep.subr.bf16.mxu1 %v4733_v47  ;;  %v4759_v59 = vld [vmem:[%s5711_s4 + $0x138] sm:$0xff]  }
 0x218   : > { %4265 = vmatpush3.bf16.msra.mxu1 %v4733_v47  ;;  %v5452_v47 = vld [vmem:[%s5713_s6] sm:$0xff]  }
 0x219   : > { %4266 = vmatprep.subr.bf16.mxu1 %v4734_v49  ;;  %4446 = vmatprep.subr.bf16.mxu0 %v5452_v47 }
 0x21a   : > { %4447 = vmatpush3.bf16.msra.mxu0 %v5452_v47 }
 0x21c   : > { %4267 = vmatpush3.bf16.msra.mxu1 %v4734_v49  ;;  %v4754_v49 = vld [vmem:[%s5711_s4 + $0x110] sm:$0xff]  }
 0x21d   : > { %4268 = vmatprep.subr.bf16.mxu1 %v4735_v43 }
 0x220   : > { %4269 = vmatpush3.bf16.msra.mxu1 %v4735_v43  ;;  %v5458_v43 = vld [vmem:[#allocation2 + $0x80] sm:$0xff] }
 0x221   : > { %4278 = vmatprep.subr.bf16.mxu1 %v4736_v51  ;;  %v2161_v50 = vpack.c.bf16 %v5458_v43, %v5374_v62  ;;  %v4760_v62 = vld [vmem:[%s5711_s4 + $0x140] sm:$0xff]  }
 0x223   : > { %4271 = vmatmul.mubr.bf16.vlgmr.msra.gmra.mrb[0].mxu1 %v5356_v57 }
 0x224   : > { %4274 = vmatprep.mubr.bf16.mxu1 %v5365_v52  ;;  %4279 = vmatpush3.bf16.msra.mxu1 %v4736_v51  ;;  %v5464_v51 = vld [vmem:[%s5713_s6 + $0x8] sm:$0xff]  }
 0x225   : > { %4280 = vmatprep.subr.bf16.mxu1 %v4737_v61  ;;  %4448 = vmatprep.subr.bf16.mxu0 %v5464_v51 }
 0x226   : > { %4449 = vmatpush3.bf16.msra.mxu0 %v5464_v51 }
 0x227   : > { %4450 = vmatprep.subr.bf16.mxu0 %v5476_v56 }
 0x228   : > { %4281 = vmatpush3.bf16.msra.mxu1 %v4737_v61  ;;  %v5489_v61 = vld [vmem:[%s5713_s6 + $0x18] sm:$0xff]  }
 0x229   : > { %4282 = vmatprep.subr.bf16.mxu1 %v4738_v55 }
 0x22a   : > { %4451 = vmatpush3.bf16.msra.mxu0 %v5476_v56 }
 0x22b   : > { %4275 = vmatmul.mubr.bf16.gmra.mrb[4].mxu1 %v5378_v63  ;;  %4452 = vmatprep.subr.bf16.mxu0 %v5489_v61 }
 0x22c   : > { %4283 = vmatpush3.bf16.msra.mxu1 %v4738_v55  ;;  %4294 = vmatprep.mubr.bf16.mxu1 %v2008_v1  ;;  %v5509_v55 = vld [vmem:[%s5713_s6 + $0x28] sm:$0xff]  }
 0x22d   : > { %4284 = vmatprep.subr.bf16.mxu1 %v4739_v0  ;;  %v4761_v1 = vld [vmem:[%s5711_s4 + $0x148] sm:$0xff]  }
 0x22e   : > { %4453 = vmatpush3.bf16.msra.mxu0 %v5489_v61 }
 0x22f   : > { %4454 = vmatprep.subr.bf16.mxu0 %v5499_v11 }
 0x230   : > { %4285 = vmatpush3.bf16.msra.mxu1 %v4739_v0  ;;  %v5529_v0 = vld [vmem:[%s5713_s6 + $0x38] sm:$0xff]  }
 0x231   : > { %4286 = vmatprep.subr.bf16.mxu1 %v4740_v2 }
 0x232   : > { %4455 = vmatpush3.bf16.msra.mxu0 %v5499_v11 }
 0x233   : > { %4456 = vmatprep.subr.bf16.mxu0 %v5509_v55 }
 0x234   : > { %4287 = vmatpush3.bf16.msra.mxu1 %v4740_v2  ;;  %v3066_v2 = vld [vmem:[%s5537_s25] sm:$0xff] }
 0x235   : > { %4288 = vmatprep.subr.bf16.mxu1 %v4741_v3 }
 0x236   : > { %4457 = vmatpush3.bf16.msra.mxu0 %v5509_v55 }
 0x237   : > { %4458 = vmatprep.subr.bf16.mxu0 %v5519_v60 }
 0x238   : > { %4289 = vmatpush3.bf16.msra.mxu1 %v4741_v3  ;;  %v3067_v3 = vld [vmem:[%s5537_s25 + $0x8] sm:$0xff] }
 0x239   : > { %4290 = vmatprep.subr.bf16.mxu1 %v4742_v5 }
 0x23a   : > { %4459 = vmatpush3.bf16.msra.mxu0 %v5519_v60 }
 0x23b   : > { %4460 = vmatprep.subr.bf16.mxu0 %v5529_v0 }
 0x23c   : > { %4291 = vmatpush3.bf16.msra.mxu1 %v4742_v5  ;;  %v3074_v5 = vpack.c.bf16 %v3067_v3, %v3066_v2 }
 0x23d   : > { %4292 = vmatprep.subr.bf16.mxu1 %v4743_v6 }
 0x23e   : > { %4461 = vmatpush3.bf16.msra.mxu0 %v5529_v0  ;;  %4462 = vmatprep.mubr.bf16.mxu0 %v3074_v5 }
 0x240   : > { %4293 = vmatpush3.bf16.msra.mxu1 %v4743_v6  ;;  %v3068_v6 = vld [vmem:[%s5537_s25 + $0x10] sm:$0xff] }
 0x241   : > { %4302 = vmatprep.subr.bf16.mxu1 %v4744_v7 }
 0x243   : > { %4295 = vmatmul.mubr.bf16.vlgmr.msra.gmra.mrb[0].mxu1 %v5402_v9 }
 0x244   : > { %4298 = vmatprep.mubr.bf16.mxu1 %v5409_v14  ;;  %4303 = vmatpush3.bf16.msra.mxu1 %v4744_v7  ;;  %v3069_v7 = vld [vmem:[%s5537_s25 + $0x18] sm:$0xff] }
 0x245   : > { %4304 = vmatprep.subr.bf16.mxu1 %v4745_v12 }
 0x248   : > { %4305 = vmatpush3.bf16.msra.mxu1 %v4745_v12  ;;  %v3075_v12 = vpack.c.bf16 %v3069_v7, %v3068_v6 }
 0x249   : > { %4306 = vmatprep.subr.bf16.mxu1 %v4746_v16 }
 0x24a   : > { %4463 = vmatmul.mubr.bf16.vlgmr.msra.gmra.mrb[8].mxu0 %v3075_v12 }
 0x24b   : > { %4299 = vmatmul.mubr.bf16.gmra.mrb[4].mxu1 %v5420_v17 }
 0x24c   : > { %4307 = vmatpush3.bf16.msra.mxu1 %v4746_v16  ;;  %4318 = vmatprep.mubr.bf16.mxu1 %v2158_v19  ;;  %v4762_v16 = vld [vmem:[%s5711_s4 + $0x150] sm:$0xff]   ;;  %v4784_v19 = vld [vmem:[%s5711_s4 + $0x200] sm:$0xff]  }
 0x24d   : > { %4308 = vmatprep.subr.bf16.mxu1 %v4747_v18 }
 0x250   : > { %4309 = vmatpush3.bf16.msra.mxu1 %v4747_v18  ;;  %v4779_v18 = vld [vmem:[%s5711_s4 + $0x1d8] sm:$0xff]  }
 0x251   : > { %4310 = vmatprep.subr.bf16.mxu1 %v4748_v21 }
 0x254   : > { %4311 = vmatpush3.bf16.msra.mxu1 %v4748_v21  ;;  %v4786_v21 = vld [vmem:[%s5711_s4 + $0x208] sm:$0xff]  }
 0x255   : > { %4312 = vmatprep.subr.bf16.mxu1 %v4749_v22 }
 0x258   : > { %4313 = vmatpush3.bf16.msra.mxu1 %v4749_v22  ;;  %v4788_v22 = vld [vmem:[%s5711_s4 + $0x210] sm:$0xff]  }
 0x259   : > { %4314 = vmatprep.subr.bf16.mxu1 %v4750_v34 }
 0x25c   : > { %4315 = vmatpush3.bf16.msra.mxu1 %v4750_v34  ;;  %v2758_v34 = vld [vmem:[#allocation2 + $0x91] sm:$0xff] }
 0x25d   : > { %4316 = vmatprep.subr.bf16.mxu1 %v4751_v24 }
 0x260   : > { %4317 = vmatpush3.bf16.msra.mxu1 %v4751_v24  ;;  %v2762_v24 = vpack.c.bf16 %v2758_v34, %v5290_v35  ;;  %v4794_v35 = vld [vmem:[%s5711_s4 + $0x228] sm:$0xff]  }
 0x261   : > { %4326 = vmatprep.subr.bf16.mxu1 %v4752_v40 }
 0x263   : > { %4319 = vmatmul.mubr.bf16.vlgmr.msra.gmra.mrb[0].mxu1 %v2159_v36  ;;  %v3070_v36 = vld [vmem:[%s5537_s25 + $0x20] sm:$0xff] }
 0x264   : > { %4322 = vmatprep.mubr.bf16.mxu1 %v2160_v44  ;;  %4327 = vmatpush3.bf16.msra.mxu1 %v4752_v40  ;;  %v4790_v40 = vld [vmem:[%s5711_s4 + $0x218] sm:$0xff]  }
 0x265   : > { %4328 = vmatprep.subr.bf16.mxu1 %v4753_v38  ;;  %v2908_v44 = vld [vmem:[#allocation2 + $0x92] sm:$0xff] }
 0x268   : > { %4329 = vmatpush3.bf16.msra.mxu1 %v4753_v38  ;;  %v3071_v38 = vld [vmem:[%s5537_s25 + $0x28] sm:$0xff] }
 0x269   : > { %4330 = vmatprep.subr.bf16.mxu1 %v4754_v49 }
 0x26b   : > { %4323 = vmatmul.mubr.bf16.gmra.mrb[4].mxu1 %v2161_v50 }
 0x26c   : > { %4331 = vmatpush3.bf16.msra.mxu1 %v4754_v49  ;;  %4342 = vmatprep.mubr.bf16.mxu1 %v2308_v23  ;;  %v4758_v23 = vld [vmem:[%s5711_s4 + $0x130] sm:$0xff]   ;;  %v3076_v49 = vpack.c.bf16 %v3071_v38, %v3070_v36 }
 0x26d   : > { %4332 = vmatprep.subr.bf16.mxu1 %v4755_v53 }
 0x270   : > { %4333 = vmatpush3.bf16.msra.mxu1 %v4755_v53 }
 0x271   : > { %4334 = vmatprep.subr.bf16.mxu1 %v4756_v58 }
 0x274   : > { %4335 = vmatpush3.bf16.msra.mxu1 %v4756_v58  ;;  %v3772_v58 = vld [vmem:[%s5712_s5] ss:$0 sm:$0xff] }
 0x275   : > { %4336 = vmatprep.subr.bf16.mxu1 %v4757_v8 }
 0x278   : > { %4337 = vmatpush3.bf16.msra.mxu1 %v4757_v8 }
 0x279   : > { %4338 = vmatprep.subr.bf16.mxu1 %v4758_v23 }
 0x27c   : > { %4339 = vmatpush3.bf16.msra.mxu1 %v4758_v23 }
 0x27d   : > { %4340 = vmatprep.subr.bf16.mxu1 %v4759_v59 }
 0x280   : > { %4341 = vmatpush3.bf16.msra.mxu1 %v4759_v59  ;;  %v3773_v59 = vld [vmem:[%s5714_s7] ss:$0 sm:$0xff] }
 0x281   : > { %4350 = vmatprep.subr.bf16.mxu1 %v4760_v62 }
 0x283   : > { %4343 = vmatmul.mubr.bf16.vlgmr.msra.gmra.mrb[0].mxu1 %v2309_v13  ;;  %v4765_v13 = vld [vmem:[%s5711_s4 + $0x168] sm:$0xff]  }
 0x284   : > { %4346 = vmatprep.mubr.bf16.mxu1 %v2310_v41  ;;  %4351 = vmatpush3.bf16.msra.mxu1 %v4760_v62  ;;  %v2461_v41 = vpack.c.bf16 %v5593_v37, %v5416_v32  ;;  %v2612_v32 = vpack.c.bf16 %v4815_v54, %v5458_v43  ;;  %v4781_v54 = vld [vmem:[%s5711_s4 + $0x1e8] sm:$0xff]   ;;  %v2912_v43 = vpack.c.bf16 %v2908_v44, %v5593_v37 }
 0x285   : > { %4352 = vmatprep.subr.bf16.mxu1 %v4761_v1 }
 0x288   : > { %4353 = vmatpush3.bf16.msra.mxu1 %v4761_v1 }
 0x289   : > { %4354 = vmatprep.subr.bf16.mxu1 %v4762_v16 }
 0x28b   : > { %4347 = vmatmul.mubr.bf16.gmra.mrb[4].mxu1 %v2311_v29  ;;  %v4770_v29 = vld [vmem:[%s5711_s4 + $0x190] sm:$0xff]  }
 0x28c   : > { %4355 = vmatpush3.bf16.msra.mxu1 %v4762_v16  ;;  %4366 = vmatprep.mubr.bf16.mxu1 %v2458_v42  ;;  %v4774_v42 = vld [vmem:[%s5711_s4 + $0x1b0] sm:$0xff]  }
 0x28d   : > { %4356 = vmatprep.subr.bf16.mxu1 %v4763_v4 }
 0x290   : > { %4357 = vmatpush3.bf16.msra.mxu1 %v4763_v4 }
 0x291   : > { %4358 = vmatprep.subr.bf16.mxu1 %v4764_v10 }
 0x294   : > { %4359 = vmatpush3.bf16.msra.mxu1 %v4764_v10 }
 0x295   : > { %4360 = vmatprep.subr.bf16.mxu1 %v4765_v13 }
 0x298   : > { %4361 = vmatpush3.bf16.msra.mxu1 %v4765_v13 }
 0x299   : > { %4362 = vmatprep.subr.bf16.mxu1 %v4766_v20 }
 0x29c   : > { %4363 = vmatpush3.bf16.msra.mxu1 %v4766_v20 }
 0x29d   : > { %4364 = vmatprep.subr.bf16.mxu1 %v4767_v33 }
 0x2a0   : > { %4365 = vmatpush3.bf16.msra.mxu1 %v4767_v33  ;;  %v4500_v33 = vadd.f32 %v3773_v59, %v3772_v58 }
 0x2a1   : > { %4374 = vmatprep.subr.bf16.mxu1 %v4768_v39 }
 0x2a3   : > { %4367 = vmatmul.mubr.bf16.vlgmr.msra.gmra.mrb[0].mxu1 %v2459_v30  ;;  %v4773_v30 = vld [vmem:[%s5711_s4 + $0x1a8] sm:$0xff]  }
 0x2a4   : > { %4370 = vmatprep.mubr.bf16.mxu1 %v2460_v48  ;;  %4375 = vmatpush3.bf16.msra.mxu1 %v4768_v39  ;;  %v4777_v48 = vld [vmem:[%s5711_s4 + $0x1c8] sm:$0xff]  }
 0x2a5   : > { %4376 = vmatprep.subr.bf16.mxu1 %v4769_v28 }
 0x2a8   : > { %4377 = vmatpush3.bf16.msra.mxu1 %v4769_v28 }
 0x2a9   : > { %4378 = vmatprep.subr.bf16.mxu1 %v4770_v29 }
 0x2ab   : > { %4371 = vmatmul.mubr.bf16.gmra.mrb[4].mxu1 %v2461_v41 }
 0x2ac   : > { %4379 = vmatpush3.bf16.msra.mxu1 %v4770_v29  ;;  %4390 = vmatprep.mubr.bf16.mxu1 %v5356_v57  ;;  %v4778_v57 = vld [vmem:[%s5711_s4 + $0x1d0] sm:$0xff]  }
 0x2ad   : > { %4380 = vmatprep.subr.bf16.mxu1 %v4771_v26 }
 0x2b0   : > { %4381 = vmatpush3.bf16.msra.mxu1 %v4771_v26 }
 0x2b1   : > { %4382 = vmatprep.subr.bf16.mxu1 %v4772_v27 }
 0x2b4   : > { %4383 = vmatpush3.bf16.msra.mxu1 %v4772_v27 }
 0x2b5   : > { %4384 = vmatprep.subr.bf16.mxu1 %v4773_v30 }
 0x2b8   : > { %4385 = vmatpush3.bf16.msra.mxu1 %v4773_v30 }
 0x2b9   : > { %4386 = vmatprep.subr.bf16.mxu1 %v4774_v42 }
 0x2bc   : > { %4387 = vmatpush3.bf16.msra.mxu1 %v4774_v42 }
 0x2bd   : > { %4388 = vmatprep.subr.bf16.mxu1 %v4775_v45 }
 0x2c0   : > { %4389 = vmatpush3.bf16.msra.mxu1 %v4775_v45 }
 0x2c1   : > { %4398 = vmatprep.subr.bf16.mxu1 %v4776_v46 }
 0x2c3   : > { %4391 = vmatmul.mubr.bf16.vlgmr.msra.gmra.mrb[0].mxu1 %v5365_v52  ;;  %v4780_v52 = vld [vmem:[%s5711_s4 + $0x1e0] sm:$0xff]  }
 0x2c4   : > { %4394 = vmatprep.mubr.bf16.mxu1 %v5378_v63  ;;  %4399 = vmatpush3.bf16.msra.mxu1 %v4776_v46  ;;  %v4782_v63 = vld [vmem:[%s5711_s4 + $0x1f0] sm:$0xff]  }
 0x2c5   : > { %4400 = vmatprep.subr.bf16.mxu1 %v4777_v48 }
 0x2c8   : > { %4401 = vmatpush3.bf16.msra.mxu1 %v4777_v48 }
 0x2c9   : > { %4402 = vmatprep.subr.bf16.mxu1 %v4778_v57 }
 0x2cb   : > { %4395 = vmatmul.mubr.bf16.gmra.mrb[4].mxu1 %v2612_v32 }
 0x2cc   : > { %4403 = vmatpush3.bf16.msra.mxu1 %v4778_v57  ;;  %4414 = vmatprep.mubr.bf16.mxu1 %v5274_v15  ;;  %v4783_v15 = vld [vmem:[%s5711_s4 + $0x1f8] sm:$0xff]  }
 0x2cd   : > { %4404 = vmatprep.subr.bf16.mxu1 %v4779_v18 }
 0x2d0   : > { %4405 = vmatpush3.bf16.msra.mxu1 %v4779_v18 }
 0x2d1   : > { %4406 = vmatprep.subr.bf16.mxu1 %v4780_v52 }
 0x2d4   : > { %4407 = vmatpush3.bf16.msra.mxu1 %v4780_v52 }
 0x2d5   : > { %4408 = vmatprep.subr.bf16.mxu1 %v4781_v54 }
 0x2d8   : > { %4409 = vmatpush3.bf16.msra.mxu1 %v4781_v54 }
 0x2d9   : > { %4410 = vmatprep.subr.bf16.mxu1 %v4782_v63 }
 0x2dc   : > { %4411 = vmatpush3.bf16.msra.mxu1 %v4782_v63 }
 0x2dd   : > { %4412 = vmatprep.subr.bf16.mxu1 %v4783_v15 }
 0x2e0   : > { %4413 = vmatpush3.bf16.msra.mxu1 %v4783_v15 }
 0x2e1   : > { %4422 = vmatprep.subr.bf16.mxu1 %v4784_v19 }
 0x2e3   : > { %4415 = vmatmul.mubr.bf16.vlgmr.msra.gmra.mrb[0].mxu1 %v5297_v25  ;;  %v4792_v25 = vld [vmem:[%s5711_s4 + $0x220] sm:$0xff]  }
 0x2e4   : > { %4418 = vmatprep.mubr.bf16.mxu1 %v5316_v31  ;;  %4423 = vmatpush3.bf16.msra.mxu1 %v4784_v19  ;;  %v4796_v31 = vld [vmem:[%s5711_s4 + $0x230] sm:$0xff]  }
 0x2e5   : > { %4424 = vmatprep.subr.bf16.mxu1 %v4786_v21 }
 0x2e8   : > { %4425 = vmatpush3.bf16.msra.mxu1 %v4786_v21 }
 0x2e9   : > { %4426 = vmatprep.subr.bf16.mxu1 %v4788_v22 }
 0x2eb   : > { %4419 = vmatmul.mubr.bf16.gmra.mrb[4].mxu1 %v2762_v24 }
 0x2ec   : > { %4427 = vmatpush3.bf16.msra.mxu1 %v4788_v22  ;;  %4438 = vmatprep.mubr.bf16.mxu1 %v5402_v9  ;;  %v4798_v9 = vld [vmem:[%s5711_s4 + $0x238] sm:$0xff]  }
 0x2ed   : > { %4428 = vmatprep.subr.bf16.mxu1 %v4790_v40 }
 0x2f0   : > { %4429 = vmatpush3.bf16.msra.mxu1 %v4790_v40 }
 0x2f1   : > { %4430 = vmatprep.subr.bf16.mxu1 %v4792_v25 }
 0x2f4   : > { %4431 = vmatpush3.bf16.msra.mxu1 %v4792_v25 }
 0x2f5   : > { %4432 = vmatprep.subr.bf16.mxu1 %v4794_v35 }
 0x2f8   : > { %4433 = vmatpush3.bf16.msra.mxu1 %v4794_v35 }
 0x2f9   : > { %4434 = vmatprep.subr.bf16.mxu1 %v4796_v31 }
 0x2fc   : > { %4435 = vmatpush3.bf16.msra.mxu1 %v4796_v31 }
 0x2fd   : > { %4436 = vmatprep.subr.bf16.mxu1 %v4798_v9 }
 0x300   : > { %4437 = vmatpush3.bf16.msra.mxu1 %v4798_v9 }
 0x301   : > { %4470 = vmatprep.subr.bf16.mxu1 %v5452_v47 }
 0x303   : > { %4439 = vmatmul.mubr.bf16.vlgmr.msra.gmra.mrb[0].mxu1 %v5409_v14  ;;  %v3072_v14 = vld [vmem:[%s5537_s25 + $0x30] sm:$0xff] }
 0x304   : > { %4442 = vmatprep.mubr.bf16.mxu1 %v5420_v17  ;;  %4478 = vmatpush3.bf16.msra.mxu1 %v5452_v47  ;;  %v3073_v17 = vld [vmem:[%s5537_s25 + $0x38] sm:$0xff] }
 0x305   : > { %4471 = vmatprep.subr.bf16.mxu1 %v5464_v51  ;;  %v3077_v47 = vpack.c.bf16 %v3073_v17, %v3072_v14 }
 0x308   : > { %4479 = vmatpush3.bf16.msra.mxu1 %v5464_v51 }
 0x309   : > { %4472 = vmatprep.subr.bf16.mxu1 %v5476_v56 }
 0x30b   : > { %4443 = vmatmul.mubr.bf16.gmra.mrb[4].mxu1 %v2912_v43 }
 0x30c   : > { %4480 = vmatpush3.bf16.msra.mxu1 %v5476_v56  ;;  %4466 = vmatprep.mubr.bf16.mxu1 %v3076_v49 }
 0x30d   : > { %4473 = vmatprep.subr.bf16.mxu1 %v5489_v61 }
 0x310   : > { %4481 = vmatpush3.bf16.msra.mxu1 %v5489_v61 }
 0x311   : > { %4474 = vmatprep.subr.bf16.mxu1 %v5499_v11 }
 0x314   : > { %4482 = vmatpush3.bf16.msra.mxu1 %v5499_v11 }
 0x315   : > { %4475 = vmatprep.subr.bf16.mxu1 %v5509_v55 }
 0x318   : > { %4483 = vmatpush3.bf16.msra.mxu1 %v5509_v55 }
 0x319   : > { %4476 = vmatprep.subr.bf16.mxu1 %v5519_v60 }
 0x31c   : > { %4484 = vmatpush3.bf16.msra.mxu1 %v5519_v60 }
 0x31d   : > { %4477 = vmatprep.subr.bf16.mxu1 %v5529_v0  ;;  %v4464_v51 = vpop.f32.mrb[8].mxu0 }
 0x31e   : > { %v3183_v50 = vpop.f32.mrb[9].mxu0 }
 0x31f   : > { %v4465_v53 = vpop.f32.mrb[10].mxu0 }
 0x320   : > { %4485 = vmatpush3.bf16.msra.mxu1 %v5529_v0  ;;  %v3186_v56 = vpop.f32.mrb[11].mxu0 }
 0x323   : > { %4467 = vmatmul.mubr.bf16.vlgmr.msra.gmra.mrb[4].mxu1 %v3077_v47 }
 0x3d6   : > { %v4440_v61 = vpop.f32.mrb[0].mxu1 }
 0x3d7   : > { %v4486_v8 = vadd.f32 %v4440_v61, %v3772_v58  ;;  %v3012_v11 = vpop.f32.mrb[1].mxu1 }
 0x3d8   : > { %v4489_v23 = vadd.f32 %v3772_v58, %v3012_v11  ;;  %v4441_v55 = vpop.f32.mrb[2].mxu1 }
 0x3d9   : > { %v4492_v60 = vadd.f32 %v4441_v55, %v3772_v58  ;;  %v4487_v62 = vadd.f32 %v4486_v8, %v4464_v51  ;;  %v3015_v0 = vpop.f32.mrb[3].mxu1 }
 0x3da   : > { %v4495_v1 = vadd.f32 %v3772_v58, %v3015_v0  ;;  %v4490_v2 = vadd.f32 %v4489_v23, %v3183_v50 }
 0x3db   : > { %v4488_v3 = vadd.f32 %v4487_v62, %v3773_v59  ;;  %v4493_v5 = vadd.f32 %v4492_v60, %v3773_v59 }
 0x3dc   : > { %v4491_v6 = vadd.f32 %v4490_v2, %v3773_v59  ;;  %v4496_v7 = vadd.f32 %v4495_v1, %v3773_v59 }
 0x3dd   : > { %v3224_v12 = vmax.f32 %v4488_v3, 0.0  ;;  %v4494_v16 = vadd.f32 %v4493_v5, %v4465_v53 }
 0x3de   : > { %v3222_v4 = vmax.f32 %v4491_v6, 0.0  ;;  %v4497_v10 = vadd.f32 %v4496_v7, %v3186_v56 }
 0x3df   : > { %3232 = vst [vmem:[%s325_s19 + $0x10] sm:$0xff] %v3224_v12  ;;  %v3225_v13 = vmax.f32 %v4494_v16, 0.0 }
 0x3e0   : > { %3230 = vst [vmem:[%s325_s19] sm:$0xff] %v3222_v4  ;;  %v3223_v20 = vmax.f32 %v4497_v10, 0.0 }
 0x3e1   : > { %3233 = vst [vmem:[%s325_s19 + $0x18] sm:$0xff] %v3225_v13 }
 0x3e2   : > { %3231 = vst [vmem:[%s325_s19 + $0x8] sm:$0xff] %v3223_v20 }
 0x3f6   : > { %v4468_v39 = vpop.f32.mrb[4].mxu1 }
 0x3f7   : > { %v4499_v28 = vadd.f32 %v4500_v33, %v4468_v39  ;;  %v3199_v29 = vpop.f32.mrb[5].mxu1 }
 0x3f8   : > { %v4501_v37 = vadd.f32 %v4500_v33, %v3199_v29  ;;  %v4469_v41 = vpop.f32.mrb[6].mxu1 }
 0x3f9   : > { %v3228_v26 = vmax.f32 %v4499_v28, 0.0  ;;  %v4503_v27 = vadd.f32 %v4500_v33, %v4469_v41  ;;  %v3202_v30 = vpop.f32.mrb[7].mxu1 }
 0x3fa   : > { %v3226_v42 = vmax.f32 %v4501_v37, 0.0  ;;  %v4505_v45 = vadd.f32 %v4500_v33, %v3202_v30 }
 0x3fb   : > { %3236 = vst [vmem:[%s325_s19 + $0x30] sm:$0xff] %v3228_v26  ;;  %v3229_v46 = vmax.f32 %v4503_v27, 0.0 }
 0x3fc   : > { %3234 = vst [vmem:[%s325_s19 + $0x20] sm:$0xff] %v3226_v42  ;;  %v3227_v48 = vmax.f32 %v4505_v45, 0.0 }
 0x3fd   : > { %3237 = vst [vmem:[%s325_s19 + $0x38] sm:$0xff] %v3229_v46 }
 0x3fe   : > { %3235 = vst [vmem:[%s325_s19 + $0x28] sm:$0xff] %v3227_v48 }
 0x3ff PF: > { %s18_s27 = sadd.s32 1, %s4813_s27  }
 0x400   : > { %p15_p4 = scmp.ge.s32.totalorder %s18_s27, 4  }
 0x402   :  { %17 = sbr.rel (!%p15_p4) target bundleno = 1 (0x1), region = 108 }

</bundles_post_ra>
